<compile_context>
chip_gen: v7x
topology: tpu7x:2x2x1
jax: 0.10.0
libtpu: 0.0.40
codegen_flags: <defaults>
</compile_context>

<pallas_src>
import functools
import math

import jax
import jax.numpy as jnp
import numpy as np
from jax.experimental import pallas as pl
from jax.experimental.pallas import tpu as pltpu


_SQRT_HALF = 1.0 / math.sqrt(2.0)
_NEG_BIG = -1e9  # bounded additive mask bias (avoids -inf/NaN for fully padded rows)
_VMEM_LIMIT = 48 * 1024 * 1024  # fits v7x's 64 MiB VMEM with headroom


def _pick_tile(dim, target, mult):
    """Largest tile t <= target with t % mult == 0 and dim % t == 0, else the full dim.

    A tile equal to the full dim always satisfies Mosaic's (8, 128) block rule,
    so this is safe for the small test shapes and tiles properly at real sizes.
    """
    if dim <= target:
        return dim
    t = (target // mult) * mult
    while t >= mult:
        if dim % t == 0:
            return t
        t -= mult
    return dim


def _gelu_erf(y):
    """Exact (erf) GELU, matches HF 'gelu'; f32 epilogue."""
    return 0.5 * y * (1.0 + jax.lax.erf(y * _SQRT_HALF))


# ----------------------------------------------------------------------------
# Tiled dense (+bias, +optional exact-erf GELU)
# ----------------------------------------------------------------------------
def _dense_kernel(x_ref, w_ref, b_ref, o_ref, acc_ref, *, act):
    """acc += x_tile @ w_tile (bf16 MXU, f32 accumulation); epilogue on last k."""
    k = pl.program_id(2)

    @pl.when(k == 0)
    def _init():
        acc_ref[...] = jnp.zeros_like(acc_ref)

    acc_ref[...] += jnp.dot(
        x_ref[...].astype(jnp.bfloat16),
        w_ref[...].astype(jnp.bfloat16),
        preferred_element_type=jnp.float32,
    )

    @pl.when(k == pl.num_programs(2) - 1)
    def _finalize():
        y = acc_ref[...] + b_ref[...]
        if act == "gelu":
            y = _gelu_erf(y)
        o_ref[...] = y.astype(o_ref.dtype)


def dense(x, w, b, act="none", tm=256, tn=256, tk=512):
    M, K = x.shape
    N = w.shape[1]
    tm = _pick_tile(M, tm, 8)
    tn = _pick_tile(N, tn, 128)
    tk = _pick_tile(K, tk, 128)
    grid = (M // tm, N // tn, K // tk)
    cost = pl.CostEstimate(
        flops=2 * M * N * K,
        transcendentals=(M * N) if act == "gelu" else 0,
        bytes_accessed=4 * (M * K + K * N + M * N + N),
    )
    return pl.pallas_call(
        functools.partial(_dense_kernel, act=act),
        out_shape=jax.ShapeDtypeStruct((M, N), x.dtype),
        grid=grid,
        in_specs=[
            pl.BlockSpec((tm, tk), lambda i, j, k: (i, k)),
            pl.BlockSpec((tk, tn), lambda i, j, k: (k, j)),
            pl.BlockSpec((1, tn), lambda i, j, k: (0, j)),
        ],
        out_specs=pl.BlockSpec((tm, tn), lambda i, j, k: (i, j)),
        scratch_shapes=[pltpu.VMEM((tm, tn), jnp.float32)],
        compiler_params=pltpu.CompilerParams(
            dimension_semantics=("parallel", "parallel", "arbitrary"),
            vmem_limit_bytes=_VMEM_LIMIT,
        ),
        cost_estimate=cost,
    )(x, w, b.reshape(1, N))


# ----------------------------------------------------------------------------
# Fused dense (+bias, +optional GELU) [+residual] + LayerNorm.
# N tile spans the full LayerNorm width so the row statistics are exact.
# Optionally emits the pre-LayerNorm dense output as a second result
# (needed for ff_out probing) from the same kernel.
# ----------------------------------------------------------------------------
def _make_dense_ln_kernel(act, eps, with_residual, emit_dense):
    def kernel(*refs):
        x_ref, w_ref, b_ref = refs[0], refs[1], refs[2]
        idx = 3
        r_ref = None
        if with_residual:
            r_ref = refs[idx]
            idx += 1
        g_ref, bt_ref = refs[idx], refs[idx + 1]
        idx += 2
        d_ref = None
        if emit_dense:
            d_ref = refs[idx]
            idx += 1
        o_ref = refs[idx]
        acc_ref = refs[idx + 1]

        k = pl.program_id(1)

        @pl.when(k == 0)
        def _init():
            acc_ref[...] = jnp.zeros_like(acc_ref)

        acc_ref[...] += jnp.dot(
            x_ref[...].astype(jnp.bfloat16),
            w_ref[...].astype(jnp.bfloat16),
            preferred_element_type=jnp.float32,
        )

        @pl.when(k == pl.num_programs(1) - 1)
        def _finalize():
            y = acc_ref[...] + b_ref[...]
            if act == "gelu":
                y = _gelu_erf(y)
            if emit_dense:
                d_ref[...] = y.astype(d_ref.dtype)
            z = y
            if with_residual:
                z = z + r_ref[...].astype(jnp.float32)
            mean = jnp.mean(z, axis=-1, keepdims=True)
            var = jnp.mean((z - mean) ** 2, axis=-1, keepdims=True)
            z = (z - mean) * jax.lax.rsqrt(var + eps)
            o_ref[...] = (z * g_ref[...] + bt_ref[...]).astype(o_ref.dtype)

    return kernel


def dense_layernorm(x, w, b, gamma, beta, residual=None, act="none",
                    emit_dense=False, eps=1e-5, tm=256, tk=512):
    M, K = x.shape
    N = w.shape[1]  # full LayerNorm width lives in one output tile
    tm = _pick_tile(M, tm, 8)
    tk = _pick_tile(K, tk, 128)
    grid = (M // tm, K // tk)

    row_spec = pl.BlockSpec((tm, N), lambda i, k: (i, 0))
    vec_spec = pl.BlockSpec((1, N), lambda i, k: (0, 0))

    in_specs = [
        pl.BlockSpec((tm, tk), lambda i, k: (i, k)),
        pl.BlockSpec((tk, N), lambda i, k: (k, 0)),
        vec_spec,
    ]
    args = [x, w, b.reshape(1, N)]
    if residual is not None:
        in_specs.append(row_spec)
        args.append(residual)
    in_specs += [vec_spec, vec_spec]
    args += [gamma.reshape(1, N), beta.reshape(1, N)]

    if emit_dense:
        out_shape = (jax.ShapeDtypeStruct((M, N), x.dtype),
                     jax.ShapeDtypeStruct((M, N), x.dtype))
        out_specs = (row_spec, row_spec)
    else:
        out_shape = jax.ShapeDtypeStruct((M, N), x.dtype)
        out_specs = row_spec

    cost = pl.CostEstimate(
        flops=2 * M * N * K + 8 * M * N,
        transcendentals=(M * N) if act == "gelu" else 0,
        bytes_accessed=4 * (M * K + K * N
                            + M * N * (2 if emit_dense else 1)
                            + (M * N if residual is not None else 0)
                            + 3 * N),
    )
    return pl.pallas_call(
        _make_dense_ln_kernel(act, eps, residual is not None, emit_dense),
        out_shape=out_shape,
        grid=grid,
        in_specs=in_specs,
        out_specs=out_specs,
        scratch_shapes=[pltpu.VMEM((tm, N), jnp.float32)],
        compiler_params=pltpu.CompilerParams(
            dimension_semantics=("parallel", "arbitrary"),
            vmem_limit_bytes=_VMEM_LIMIT,
        ),
        cost_estimate=cost,
    )(*args)


# ----------------------------------------------------------------------------
# Row-tiled LayerNorm (embedding output only; encoder LNs are fused into dense)
# ----------------------------------------------------------------------------
def _ln_kernel(x_ref, g_ref, b_ref, o_ref, *, eps):
    x = x_ref[...].astype(jnp.float32)
    mean = jnp.mean(x, axis=-1, keepdims=True)
    var = jnp.mean((x - mean) ** 2, axis=-1, keepdims=True)
    y = (x - mean) * jax.lax.rsqrt(var + eps)
    o_ref[...] = (y * g_ref[...] + b_ref[...]).astype(o_ref.dtype)


def layernorm(x, gamma, beta, eps=1e-5, tm=512):
    M, H = x.shape
    tm = _pick_tile(M, tm, 8)
    grid = (M // tm,)
    row_spec = pl.BlockSpec((tm, H), lambda i: (i, 0))
    vec_spec = pl.BlockSpec((1, H), lambda i: (0, 0))
    return pl.pallas_call(
        functools.partial(_ln_kernel, eps=eps),
        out_shape=jax.ShapeDtypeStruct((M, H), x.dtype),
        grid=grid,
        in_specs=[row_spec, vec_spec, vec_spec],
        out_specs=row_spec,
        compiler_params=pltpu.CompilerParams(dimension_semantics=("parallel",)),
    )(x, gamma.reshape(1, H), beta.reshape(1, H))


# ----------------------------------------------------------------------------
# Attention: one grid step per batch element, all heads in-kernel, fused-QKV
# input (no XLA q/k/v slice copies), merged-head lane-dense (T, H) output.
# ----------------------------------------------------------------------------
def _attn_kernel(qkv_ref, m_ref, o_ref, *, scale, n_heads, d_head, hidden_size):
    qkv = qkv_ref[...]      # (T, 3H) f32
    m = m_ref[...]          # (1, T) additive mask bias (broadcast over query rows)
    ctx_heads = []
    for h in range(n_heads):
        lo = h * d_head
        hi = lo + d_head
        qh = (qkv[:, lo:hi] * scale).astype(jnp.bfloat16)           # scale folded into Q
        kh = qkv[:, hidden_size + lo:hidden_size + hi].astype(jnp.bfloat16)
        vh = qkv[:, 2 * hidden_size + lo:2 * hidden_size + hi].astype(jnp.bfloat16)
        s = jax.lax.dot_general(
            qh, kh, (((1,), (1,)), ((), ())),
            preferred_element_type=jnp.float32,
        ) + m                                                        # (T, T) f32
        s = s - jnp.max(s, axis=-1, keepdims=True)
        p = jnp.exp(s)
        p = p * pl.reciprocal(jnp.sum(p, axis=-1, keepdims=True), approx=True)
        ctx = jnp.dot(p.astype(jnp.bfloat16), vh,
                      preferred_element_type=jnp.float32)            # (T, dh) f32
        ctx_heads.append(ctx)
    o_ref[...] = jnp.concatenate(ctx_heads, axis=-1).astype(o_ref.dtype)


def mha_attention(qkv, mask_bias, n_heads, d_head, hidden_size, scale):
    """qkv: (B, T, 3H) fused projection; mask_bias: (B, 1, T) additive f32."""
    B, T, H3 = qkv.shape
    qkv_spec = pl.BlockSpec((pl.Squeezed(), T, H3), lambda b: (b, 0, 0))
    mask_spec = pl.BlockSpec((pl.Squeezed(), 1, T), lambda b: (b, 0, 0))
    out_spec = pl.BlockSpec((pl.Squeezed(), T, hidden_size), lambda b: (b, 0, 0))
    return pl.pallas_call(
        functools.partial(_attn_kernel, scale=scale, n_heads=n_heads,
                          d_head=d_head, hidden_size=hidden_size),
        out_shape=jax.ShapeDtypeStruct((B, T, hidden_size), qkv.dtype),
        grid=(B,),
        in_specs=[qkv_spec, mask_spec],
        out_specs=out_spec,
        compiler_params=pltpu.CompilerParams(
            dimension_semantics=("parallel",),
            vmem_limit_bytes=_VMEM_LIMIT,
        ),
    )(qkv, mask_bias)


# ----------------------------------------------------------------------------
# Parameter init (deterministic, synthetic — stands in for the HF checkpoint)
# ----------------------------------------------------------------------------
def init_params(key, cfg):
    H, FF, V = cfg["hidden"], cfg["ff"], cfg["vocab"]
    keys = iter(jax.random.split(key, 256))

    def nrm(shape, scale=0.02):
        return scale * jax.random.normal(next(keys), shape, dtype=jnp.float32)

    params = {
        "word_emb": nrm((V, H)),
        "pos_emb": nrm((cfg["max_pos"], H)),
        "type_emb": nrm((1, H)),
        "emb_ln_g": jnp.ones((H,), jnp.float32),
        "emb_ln_b": jnp.zeros((H,), jnp.float32),
        "layers": [],
        "lm_dense_w": nrm((H, H)),
        "lm_dense_b": jnp.zeros((H,), jnp.float32),
        "lm_ln_g": jnp.ones((H,), jnp.float32),
        "lm_ln_b": jnp.zeros((H,), jnp.float32),
        "dec_w": nrm((H, V)),
        "dec_b": jnp.zeros((V,), jnp.float32),
    }
    for _ in range(cfg["layers"]):
        params["layers"].append(
            {
                # fused QKV projection: (H, 3H) weight, (3H,) bias
                "wqkv": nrm((H, 3 * H)), "bqkv": jnp.zeros((3 * H,), jnp.float32),
                "wo": nrm((H, H)), "bo": jnp.zeros((H,), jnp.float32),
                "ln1_g": jnp.ones((H,), jnp.float32),
                "ln1_b": jnp.zeros((H,), jnp.float32),
                "wi": nrm((H, FF)), "bi": jnp.zeros((FF,), jnp.float32),
                "wf": nrm((FF, H)), "bf": jnp.zeros((H,), jnp.float32),
                "ln2_g": jnp.ones((H,), jnp.float32),
                "ln2_b": jnp.zeros((H,), jnp.float32),
            }
        )
    return params


# ----------------------------------------------------------------------------
# Forward pass (mirrors XLMRobertaModelForProbing.forward)
# ----------------------------------------------------------------------------
def model_forward(params, input_ids, attention_mask, cfg):
    B, T = input_ids.shape
    H, nH = cfg["hidden"], cfg["heads"]
    dh = H // nH

    # --- embeddings (RoBERTa-style position ids from the padding index) ---
    pad = cfg["pad_id"]
    not_pad = (input_ids != pad).astype(jnp.int32)
    position_ids = jnp.cumsum(not_pad, axis=1) * not_pad + pad
    emb = (
        jnp.take(params["word_emb"], input_ids, axis=0)
        + jnp.take(params["pos_emb"], position_ids, axis=0)
        + params["type_emb"][0][None, None, :]
    )
    hidden = layernorm(
        emb.reshape(B * T, H), params["emb_ln_g"], params["emb_ln_b"]
    )  # dropout is identity in eval

    # --- extended attention mask: bounded additive bias, shape (B, 1, T) ---
    mask_bias = (
        (1.0 - attention_mask.astype(jnp.float32)) * _NEG_BIG
    ).reshape(B, 1, T)

    scale = 1.0 / math.sqrt(dh)
    ff_act_list, ff_out_list = [], []
    for L in params["layers"]:
        qkv = dense(hidden, L["wqkv"], L["bqkv"])            # fused QKV: (B*T, 3H)
        ctx = mha_attention(qkv.reshape(B, T, 3 * H), mask_bias, nH, dh, H, scale)
        # fused: out-proj + bias + residual + LayerNorm (1 HBM round trip saved)
        attention_output = dense_layernorm(
            ctx.reshape(B * T, H), L["wo"], L["bo"], L["ln1_g"], L["ln1_b"],
            residual=hidden,
        )
        ff_act = dense(attention_output, L["wi"], L["bi"], act="gelu")
        # fused: FF out-proj + bias + residual + LayerNorm; also emits the
        # pre-LN dense output (ff_out) needed for probing.
        ff_out, hidden = dense_layernorm(
            ff_act, L["wf"], L["bf"], L["ln2_g"], L["ln2_b"],
            residual=attention_output, emit_dense=True,
        )
        ff_act_list.append(ff_act.reshape(B, T, -1))
        ff_out_list.append(ff_out.reshape(B, T, H))

    # --- lm_head: fused dense + gelu + layernorm, then decoder + bias ---
    h = dense_layernorm(
        hidden, params["lm_dense_w"], params["lm_dense_b"],
        params["lm_ln_g"], params["lm_ln_b"], act="gelu",
    )
    # decoder: vocab dim tiled lane-dense (large N tile), K double-buffered
    logits = dense(h, params["dec_w"], params["dec_b"], tn=2048)
    return logits.reshape(B, T, -1), ff_act_list, ff_out_list


# ----------------------------------------------------------------------------
if __name__ == "__main__":
    cfg = dict(vocab=64, hidden=32, heads=4, ff=64, layers=2,
               max_pos=16, pad_id=1, mask_id=4)
    B, T = 2, 8

    key = jax.random.PRNGKey(0)
    pkey, dkey = jax.random.split(key)
    params = init_params(pkey, cfg)

    # synthetic token ids: regular tokens in [5, vocab), some <mask>, some <pad>
    input_ids = jax.random.randint(dkey, (B, T), 5, cfg["vocab"], dtype=jnp.int32)
    input_ids = input_ids.at[0, 3].set(cfg["mask_id"])
    input_ids = input_ids.at[1, 2].set(cfg["mask_id"])
    input_ids = input_ids.at[1, 6:].set(cfg["pad_id"])
    attention_mask = (input_ids != cfg["pad_id"]).astype(jnp.int32)

    fwd = jax.jit(functools.partial(model_forward, cfg=cfg))
    logits, ff_act, ff_out = fwd(params, input_ids, attention_mask)
    jax.block_until_ready((logits, ff_act, ff_out))

    # mask_index bookkeeping (python glue, same as the torch .nonzero() loop)
    # TODO(synk): data-dependent .nonzero() has no Pallas equivalent; kept on host.
    ids_np = np.asarray(input_ids)
    mask_index = [
        [int(j) for j in np.nonzero(ids_np[i] == cfg["mask_id"])[0]]
        for i in range(B)
    ]

    result = {
        "logits": logits,          # (B, T, vocab)
        "ff_act": ff_act,          # list of (B, T, ff) per layer
        "ff_out": ff_out,          # list of (B, T, hidden) per layer
        "mask_index": mask_index,  # list of per-example mask positions
    }
    assert result["logits"].shape == (B, T, cfg["vocab"])
    assert len(result["ff_act"]) == cfg["layers"]
    assert len(result["ff_out"]) == cfg["layers"]
    assert all(f.shape == (B, T, cfg["ff"]) for f in result["ff_act"])
    assert all(f.shape == (B, T, cfg["hidden"]) for f in result["ff_out"])
    assert bool(jnp.all(jnp.isfinite(result["logits"])))
    print("KERNEL_OK")
</pallas_src>

<mosaic_0001>
module attributes {stable_mosaic.version = 11 : i64} {
  func.func @_dense_kernel(%arg0: i32, %arg1: i32, %arg2: i32, %arg3: memref<16x32xf32, #tpu.memory_space<vmem>>, %arg4: memref<32x96xf32, #tpu.memory_space<vmem>>, %arg5: memref<1x96xf32, #tpu.memory_space<vmem>>, %arg6: memref<16x96xf32, #tpu.memory_space<vmem>>, %arg7: memref<16x96xf32, #tpu.memory_space<vmem>>) attributes {dimension_semantics = [#tpu.dimension_semantics<parallel>, #tpu.dimension_semantics<parallel>, #tpu.dimension_semantics<arbitrary>], iteration_bounds = array<i64: 1, 1, 1>, scalar_prefetch = 0 : i64, scratch_operands = 1 : i64, tpu.core_type = #tpu.core_type<tc>, window_params = [{transform_indices = @transform_0, window_bounds = array<i64: 16, 32>}, {transform_indices = @transform_1, window_bounds = array<i64: 32, 96>}, {transform_indices = @transform_2, window_bounds = array<i64: 1, 96>}, {transform_indices = @transform_3, window_bounds = array<i64: 16, 96>}]} {
    %c0_i32 = arith.constant 0 : i32
    %0 = arith.cmpi eq, %arg2, %c0_i32 : i32
    %1 = arith.extui %0 : i1 to i32
    %c0_i32_0 = arith.constant 0 : i32
    %2 = arith.cmpi ne, %1, %c0_i32_0 : i32
    scf.if %2 {
      %cst_10 = arith.constant 0.000000e+00 : f32
      %14 = vector.broadcast %cst_10 : f32 to vector<16x96xf32>
      %c0_11 = arith.constant 0 : index
      %c0_12 = arith.constant 0 : index
      %15 = vector.load %arg7[%c0_11, %c0_12] : memref<16x96xf32, #tpu.memory_space<vmem>>, vector<16x96xf32>
      tpu.vector_store %arg7[%c0_11, %c0_12], %14 {strides = array<i32>} : memref<16x96xf32, #tpu.memory_space<vmem>>, vector<16x96xf32>,
    } else {
    }
    %c0 = arith.constant 0 : index
    %c0_1 = arith.constant 0 : index
    %3 = vector.load %arg7[%c0, %c0_1] : memref<16x96xf32, #tpu.memory_space<vmem>>, vector<16x96xf32>
    %c0_2 = arith.constant 0 : index
    %c0_3 = arith.constant 0 : index
    %4 = vector.load %arg3[%c0_2, %c0_3] : memref<16x32xf32, #tpu.memory_space<vmem>>, vector<16x32xf32>
    %5 = arith.truncf %4 : vector<16x32xf32> to vector<16x32xbf16>
    %c0_4 = arith.constant 0 : index
    %c0_5 = arith.constant 0 : index
    %6 = vector.load %arg4[%c0_4, %c0_5] : memref<32x96xf32, #tpu.memory_space<vmem>>, vector<32x96xf32>
    %7 = arith.truncf %6 : vector<32x96xf32> to vector<32x96xbf16>
    %cst = arith.constant dense<0.000000e+00> : vector<16x96xf32>
    %8 = tpu.matmul %5, %7, %cst {dimension_numbers = #tpu.dot_dimension_numbers<[1], [0], [0], [1], [0, 0, 1, 1], [], []>} : vector<16x32xbf16>, vector<32x96xbf16>, vector<16x96xf32> -> vector<16x96xf32>
    %9 = arith.addf %3, %8 : vector<16x96xf32>
    %c0_6 = arith.constant 0 : index
    %c0_7 = arith.constant 0 : index
    %10 = vector.load %arg7[%c0_6, %c0_7] : memref<16x96xf32, #tpu.memory_space<vmem>>, vector<16x96xf32>
    tpu.vector_store %arg7[%c0_6, %c0_7], %9 {strides = array<i32>} : memref<16x96xf32, #tpu.memory_space<vmem>>, vector<16x96xf32>,
    %c0_i32_8 = arith.constant 0 : i32
    %11 = arith.cmpi eq, %arg2, %c0_i32_8 : i32
    %12 = arith.extui %11 : i1 to i32
    %c0_i32_9 = arith.constant 0 : i32
    %13 = arith.cmpi ne, %12, %c0_i32_9 : i32
    scf.if %13 {
      %c0_10 = arith.constant 0 : index
      %c0_11 = arith.constant 0 : index
      %14 = vector.load %arg7[%c0_10, %c0_11] : memref<16x96xf32, #tpu.memory_space<vmem>>, vector<16x96xf32>
      %c0_12 = arith.constant 0 : index
      %c0_13 = arith.constant 0 : index
      %15 = vector.load %arg5[%c0_12, %c0_13] : memref<1x96xf32, #tpu.memory_space<vmem>>, vector<1x96xf32>
      %16 = vector.broadcast %15 : vector<1x96xf32> to vector<16x96xf32>
      %17 = arith.addf %14, %16 : vector<16x96xf32>
      %c0_14 = arith.constant 0 : index
      %c0_15 = arith.constant 0 : index
      %18 = vector.load %arg6[%c0_14, %c0_15] : memref<16x96xf32, #tpu.memory_space<vmem>>, vector<16x96xf32>
      tpu.vector_store %arg6[%c0_14, %c0_15], %17 {strides = array<i32>} : memref<16x96xf32, #tpu.memory_space<vmem>>, vector<16x96xf32>,
    } else {
    }
    return
  }
  func.func @transform_0(%arg0: i32, %arg1: i32, %arg2: i32) -> (i32, i32) {
    %c0_i32 = arith.constant 0 : i32
    return %arg0, %arg2 : i32, i32
  }
  func.func @transform_1(%arg0: i32, %arg1: i32, %arg2: i32) -> (i32, i32) {
    %c0_i32 = arith.constant 0 : i32
    return %arg2, %arg1 : i32, i32
  }
  func.func @transform_2(%arg0: i32, %arg1: i32, %arg2: i32) -> (i32, i32) {
    %c0_i32 = arith.constant 0 : i32
    %c0_i32_0 = arith.constant 0 : i32
    return %c0_i32, %arg1 : i32, i32
  }
  func.func @transform_3(%arg0: i32, %arg1: i32, %arg2: i32) -> (i32, i32) {
    %c0_i32 = arith.constant 0 : i32
    return %arg0, %arg1 : i32, i32
  }
}

module attributes {stable_mosaic.version = 11 : i64} {
  func.func @kernel(%arg0: i32, %arg1: i32, %arg2: memref<16x32xf32, #tpu.memory_space<vmem>>, %arg3: memref<32x32xf32, #tpu.memory_space<vmem>>, %arg4: memref<1x32xf32, #tpu.memory_space<vmem>>, %arg5: memref<16x32xf32, #tpu.memory_space<vmem>>, %arg6: memref<1x32xf32, #tpu.memory_space<vmem>>, %arg7: memref<1x32xf32, #tpu.memory_space<vmem>>, %arg8: memref<16x32xf32, #tpu.memory_space<vmem>>, %arg9: memref<16x32xf32, #tpu.memory_space<vmem>>) attributes {dimension_semantics = [#tpu.dimension_semantics<parallel>, #tpu.dimension_semantics<arbitrary>], iteration_bounds = array<i64: 1, 1>, scalar_prefetch = 0 : i64, scratch_operands = 1 : i64, tpu.core_type = #tpu.core_type<tc>, window_params = [{transform_indices = @transform_0, window_bounds = array<i64: 16, 32>}, {transform_indices = @transform_1, window_bounds = array<i64: 32, 32>}, {pipeline_mode = #tpu.pipeline_mode<synchronous>, transform_indices = @transform_2, window_bounds = array<i64: 1, 32>}, {transform_indices = @transform_3, window_bounds = array<i64: 16, 32>}, {pipeline_mode = #tpu.pipeline_mode<synchronous>, transform_indices = @transform_4, window_bounds = array<i64: 1, 32>}, {pipeline_mode = #tpu.pipeline_mode<synchronous>, transform_indices = @transform_5, window_bounds = array<i64: 1, 32>}, {transform_indices = @transform_6, window_bounds = array<i64: 16, 32>}]} {
    %c0_i32 = arith.constant 0 : i32
    %0 = arith.cmpi eq, %arg1, %c0_i32 : i32
    %1 = arith.extui %0 : i1 to i32
    %c0_i32_0 = arith.constant 0 : i32
    %2 = arith.cmpi ne, %1, %c0_i32_0 : i32
    scf.if %2 {
      %cst_10 = arith.constant 0.000000e+00 : f32
      %14 = vector.broadcast %cst_10 : f32 to vector<16x32xf32>
      %c0_11 = arith.constant 0 : index
      %c0_12 = arith.constant 0 : index
      %15 = vector.load %arg9[%c0_11, %c0_12] : memref<16x32xf32, #tpu.memory_space<vmem>>, vector<16x32xf32>
      tpu.vector_store %arg9[%c0_11, %c0_12], %14 {strides = array<i32>} : memref<16x32xf32, #tpu.memory_space<vmem>>, vector<16x32xf32>,
    } else {
    }
    %c0 = arith.constant 0 : index
    %c0_1 = arith.constant 0 : index
    %3 = vector.load %arg9[%c0, %c0_1] : memref<16x32xf32, #tpu.memory_space<vmem>>, vector<16x32xf32>
    %c0_2 = arith.constant 0 : index
    %c0_3 = arith.constant 0 : index
    %4 = vector.load %arg2[%c0_2, %c0_3] : memref<16x32xf32, #tpu.memory_space<vmem>>, vector<16x32xf32>
    %5 = arith.truncf %4 : vector<16x32xf32> to vector<16x32xbf16>
    %c0_4 = arith.constant 0 : index
    %c0_5 = arith.constant 0 : index
    %6 = vector.load %arg3[%c0_4, %c0_5] : memref<32x32xf32, #tpu.memory_space<vmem>>, vector<32x32xf32>
    %7 = arith.truncf %6 : vector<32x32xf32> to vector<32x32xbf16>
    %cst = arith.constant dense<0.000000e+00> : vector<16x32xf32>
    %8 = tpu.matmul %5, %7, %cst {dimension_numbers = #tpu.dot_dimension_numbers<[1], [0], [0], [1], [0, 0, 1, 1], [], []>} : vector<16x32xbf16>, vector<32x32xbf16>, vector<16x32xf32> -> vector<16x32xf32>
    %9 = arith.addf %3, %8 : vector<16x32xf32>
    %c0_6 = arith.constant 0 : index
    %c0_7 = arith.constant 0 : index
    %10 = vector.load %arg9[%c0_6, %c0_7] : memref<16x32xf32, #tpu.memory_space<vmem>>, vector<16x32xf32>
    tpu.vector_store %arg9[%c0_6, %c0_7], %9 {strides = array<i32>} : memref<16x32xf32, #tpu.memory_space<vmem>>, vector<16x32xf32>,
    %c0_i32_8 = arith.constant 0 : i32
    %11 = arith.cmpi eq, %arg1, %c0_i32_8 : i32
    %12 = arith.extui %11 : i1 to i32
    %c0_i32_9 = arith.constant 0 : i32
    %13 = arith.cmpi ne, %12, %c0_i32_9 : i32
    scf.if %13 {
      %c0_10 = arith.constant 0 : index
      %c0_11 = arith.constant 0 : index
      %14 = vector.load %arg9[%c0_10, %c0_11] : memref<16x32xf32, #tpu.memory_space<vmem>>, vector<16x32xf32>
      %c0_12 = arith.constant 0 : index
      %c0_13 = arith.constant 0 : index
      %15 = vector.load %arg4[%c0_12, %c0_13] : memref<1x32xf32, #tpu.memory_space<vmem>>, vector<1x32xf32>
      %16 = vector.broadcast %15 : vector<1x32xf32> to vector<16x32xf32>
      %17 = arith.addf %14, %16 : vector<16x32xf32>
      %c0_14 = arith.constant 0 : index
      %c0_15 = arith.constant 0 : index
      %18 = vector.load %arg5[%c0_14, %c0_15] : memref<16x32xf32, #tpu.memory_space<vmem>>, vector<16x32xf32>
      %19 = arith.addf %17, %18 : vector<16x32xf32>
      %cst_16 = arith.constant dense<0.000000e+00> : vector<16xf32>
      %20 = vector.multi_reduction <add>, %19, %cst_16 [1] : vector<16x32xf32> to vector<16xf32>
      %21 = vector.shape_cast %20 : vector<16xf32> to vector<16x1xf32>
      %cst_17 = arith.constant 3.200000e+01 : f32
      %22 = vector.broadcast %cst_17 : f32 to vector<16x1xf32>
      %23 = arith.divf %21, %22 : vector<16x1xf32>
      %24 = vector.broadcast %23 : vector<16x1xf32> to vector<16x32xf32>
      %25 = arith.subf %19, %24 : vector<16x32xf32>
      %26 = arith.mulf %25, %25 : vector<16x32xf32>
      %cst_18 = arith.constant dense<0.000000e+00> : vector<16xf32>
      %27 = vector.multi_reduction <add>, %26, %cst_18 [1] : vector<16x32xf32> to vector<16xf32>
      %28 = vector.shape_cast %27 : vector<16xf32> to vector<16x1xf32>
      %cst_19 = arith.constant 3.200000e+01 : f32
      %29 = vector.broadcast %cst_19 : f32 to vector<16x1xf32>
      %30 = arith.divf %28, %29 : vector<16x1xf32>
      %31 = vector.broadcast %23 : vector<16x1xf32> to vector<16x32xf32>
      %32 = arith.subf %19, %31 : vector<16x32xf32>
      %cst_20 = arith.constant 9.99999974E-6 : f32
      %33 = vector.broadcast %cst_20 : f32 to vector<16x1xf32>
      %34 = arith.addf %30, %33 : vector<16x1xf32>
      %35 = math.rsqrt %34 : vector<16x1xf32>
      %36 = vector.broadcast %35 : vector<16x1xf32> to vector<16x32xf32>
      %37 = arith.mulf %32, %36 : vector<16x32xf32>
      %c0_21 = arith.constant 0 : index
      %c0_22 = arith.constant 0 : index
      %38 = vector.load %arg6[%c0_21, %c0_22] : memref<1x32xf32, #tpu.memory_space<vmem>>, vector<1x32xf32>
      %39 = vector.broadcast %38 : vector<1x32xf32> to vector<16x32xf32>
      %40 = arith.mulf %37, %39 : vector<16x32xf32>
      %c0_23 = arith.constant 0 : index
      %c0_24 = arith.constant 0 : index
      %41 = vector.load %arg7[%c0_23, %c0_24] : memref<1x32xf32, #tpu.memory_space<vmem>>, vector<1x32xf32>
      %42 = vector.broadcast %41 : vector<1x32xf32> to vector<16x32xf32>
      %43 = arith.addf %40, %42 : vector<16x32xf32>
      %c0_25 = arith.constant 0 : index
      %c0_26 = arith.constant 0 : index
      %44 = vector.load %arg8[%c0_25, %c0_26] : memref<16x32xf32, #tpu.memory_space<vmem>>, vector<16x32xf32>
      tpu.vector_store %arg8[%c0_25, %c0_26], %43 {strides = array<i32>} : memref<16x32xf32, #tpu.memory_space<vmem>>, vector<16x32xf32>,
    } else {
    }
    return
  }
  func.func @transform_0(%arg0: i32, %arg1: i32) -> (i32, i32) {
    %c0_i32 = arith.constant 0 : i32
    return %arg0, %arg1 : i32, i32
  }
  func.func @transform_1(%arg0: i32, %arg1: i32) -> (i32, i32) {
    %c0_i32 = arith.constant 0 : i32
    %c0_i32_0 = arith.constant 0 : i32
    return %arg1, %c0_i32 : i32, i32
  }
  func.func @transform_2(%arg0: i32, %arg1: i32) -> (i32, i32) {
    %c0_i32 = arith.constant 0 : i32
    %c0_i32_0 = arith.constant 0 : i32
    %c0_i32_1 = arith.constant 0 : i32
    return %c0_i32, %c0_i32_0 : i32, i32
  }
  func.func @transform_3(%arg0: i32, %arg1: i32) -> (i32, i32) {
    %c0_i32 = arith.constant 0 : i32
    %c0_i32_0 = arith.constant 0 : i32
    return %arg0, %c0_i32 : i32, i32
  }
  func.func @transform_4(%arg0: i32, %arg1: i32) -> (i32, i32) {
    %c0_i32 = arith.constant 0 : i32
    %c0_i32_0 = arith.constant 0 : i32
    %c0_i32_1 = arith.constant 0 : i32
    return %c0_i32, %c0_i32_0 : i32, i32
  }
  func.func @transform_5(%arg0: i32, %arg1: i32) -> (i32, i32) {
    %c0_i32 = arith.constant 0 : i32
    %c0_i32_0 = arith.constant 0 : i32
    %c0_i32_1 = arith.constant 0 : i32
    return %c0_i32, %c0_i32_0 : i32, i32
  }
  func.func @transform_6(%arg0: i32, %arg1: i32) -> (i32, i32) {
    %c0_i32 = arith.constant 0 : i32
    %c0_i32_0 = arith.constant 0 : i32
    return %arg0, %c0_i32 : i32, i32
  }
}

module attributes {stable_mosaic.version = 11 : i64} {
  func.func @_attn_kernel(%arg0: i32, %arg1: memref<1x8x96xf32, #tpu.memory_space<vmem>>, %arg2: memref<1x1x8xf32, #tpu.memory_space<vmem>>, %arg3: memref<1x8x32xf32, #tpu.memory_space<vmem>>) attributes {dimension_semantics = [#tpu.dimension_semantics<parallel>], iteration_bounds = array<i64: 2>, scalar_prefetch = 0 : i64, scratch_operands = 0 : i64, tpu.core_type = #tpu.core_type<tc>, window_params = [{transform_indices = @transform_0, window_bounds = array<i64: 1, 8, 96>}, {transform_indices = @transform_1, window_bounds = array<i64: 1, 1, 8>}, {transform_indices = @transform_2, window_bounds = array<i64: 1, 8, 32>}]} {
    %c0 = arith.constant 0 : index
    %c0_0 = arith.constant 0 : index
    %c0_1 = arith.constant 0 : index
    %0 = vector.load %arg1[%c0, %c0_0, %c0_1] : memref<1x8x96xf32, #tpu.memory_space<vmem>>, vector<1x8x96xf32>
    %1 = vector.shape_cast %0 : vector<1x8x96xf32> to vector<8x96xf32>
    %c0_2 = arith.constant 0 : index
    %c0_3 = arith.constant 0 : index
    %c0_4 = arith.constant 0 : index
    %2 = vector.load %arg2[%c0_2, %c0_3, %c0_4] : memref<1x1x8xf32, #tpu.memory_space<vmem>>, vector<1x1x8xf32>
    %3 = vector.shape_cast %2 : vector<1x1x8xf32> to vector<1x8xf32>
    %4 = vector.extract_strided_slice %1 {offsets = [0, 0], sizes = [8, 8], strides = [1, 1]} : vector<8x96xf32> to vector<8x8xf32>
    %cst = arith.constant 0.353553385 : f32
    %5 = vector.broadcast %cst : f32 to vector<8x8xf32>
    %6 = arith.mulf %4, %5 : vector<8x8xf32>
    %7 = arith.truncf %6 : vector<8x8xf32> to vector<8x8xbf16>
    %8 = vector.extract_strided_slice %1 {offsets = [0, 32], sizes = [8, 8], strides = [1, 1]} : vector<8x96xf32> to vector<8x8xf32>
    %9 = arith.truncf %8 : vector<8x8xf32> to vector<8x8xbf16>
    %10 = vector.extract_strided_slice %1 {offsets = [0, 64], sizes = [8, 8], strides = [1, 1]} : vector<8x96xf32> to vector<8x8xf32>
    %11 = arith.truncf %10 : vector<8x8xf32> to vector<8x8xbf16>
    %cst_5 = arith.constant dense<0.000000e+00> : vector<8x8xf32>
    %12 = tpu.matmul %7, %9, %cst_5 {dimension_numbers = #tpu.dot_dimension_numbers<[1], [1], [0], [0], [0, 0, 1, 0], [], []>} : vector<8x8xbf16>, vector<8x8xbf16>, vector<8x8xf32> -> vector<8x8xf32>
    %13 = vector.broadcast %3 : vector<1x8xf32> to vector<8x8xf32>
    %14 = arith.addf %12, %13 : vector<8x8xf32>
    %cst_6 = arith.constant dense<0xFF800000> : vector<8xf32>
    %15 = vector.multi_reduction <maximumf>, %14, %cst_6 [1] : vector<8x8xf32> to vector<8xf32>
    %16 = vector.shape_cast %15 : vector<8xf32> to vector<8x1xf32>
    %17 = vector.broadcast %16 : vector<8x1xf32> to vector<8x8xf32>
    %18 = arith.subf %14, %17 : vector<8x8xf32>
    %19 = math.exp %18 : vector<8x8xf32>
    %cst_7 = arith.constant dense<0.000000e+00> : vector<8xf32>
    %20 = vector.multi_reduction <add>, %19, %cst_7 [1] : vector<8x8xf32> to vector<8xf32>
    %21 = vector.shape_cast %20 : vector<8xf32> to vector<8x1xf32>
    %22 = tpu.reciprocal %21 {approx = true} : vector<8x1xf32> -> vector<8x1xf32>
    %23 = vector.broadcast %22 : vector<8x1xf32> to vector<8x8xf32>
    %24 = arith.mulf %19, %23 : vector<8x8xf32>
    %25 = arith.truncf %24 : vector<8x8xf32> to vector<8x8xbf16>
    %cst_8 = arith.constant dense<0.000000e+00> : vector<8x8xf32>
    %26 = tpu.matmul %25, %11, %cst_8 {dimension_numbers = #tpu.dot_dimension_numbers<[1], [0], [0], [1], [0, 0, 1, 1], [], []>} : vector<8x8xbf16>, vector<8x8xbf16>, vector<8x8xf32> -> vector<8x8xf32>
    %27 = vector.extract_strided_slice %1 {offsets = [0, 8], sizes = [8, 8], strides = [1, 1]} : vector<8x96xf32> to vector<8x8xf32>
    %cst_9 = arith.constant 0.353553385 : f32
    %28 = vector.broadcast %cst_9 : f32 to vector<8x8xf32>
    %29 = arith.mulf %27, %28 : vector<8x8xf32>
    %30 = arith.truncf %29 : vector<8x8xf32> to vector<8x8xbf16>
    %31 = vector.extract_strided_slice %1 {offsets = [0, 40], sizes = [8, 8], strides = [1, 1]} : vector<8x96xf32> to vector<8x8xf32>
    %32 = arith.truncf %31 : vector<8x8xf32> to vector<8x8xbf16>
    %33 = vector.extract_strided_slice %1 {offsets = [0, 72], sizes = [8, 8], strides = [1, 1]} : vector<8x96xf32> to vector<8x8xf32>
    %34 = arith.truncf %33 : vector<8x8xf32> to vector<8x8xbf16>
    %cst_10 = arith.constant dense<0.000000e+00> : vector<8x8xf32>
    %35 = tpu.matmul %30, %32, %cst_10 {dimension_numbers = #tpu.dot_dimension_numbers<[1], [1], [0], [0], [0, 0, 1, 0], [], []>} : vector<8x8xbf16>, vector<8x8xbf16>, vector<8x8xf32> -> vector<8x8xf32>
    %36 = vector.broadcast %3 : vector<1x8xf32> to vector<8x8xf32>
    %37 = arith.addf %35, %36 : vector<8x8xf32>
    %cst_11 = arith.constant dense<0xFF800000> : vector<8xf32>
    %38 = vector.multi_reduction <maximumf>, %37, %cst_11 [1] : vector<8x8xf32> to vector<8xf32>
    %39 = vector.shape_cast %38 : vector<8xf32> to vector<8x1xf32>
    %40 = vector.broadcast %39 : vector<8x1xf32> to vector<8x8xf32>
    %41 = arith.subf %37, %40 : vector<8x8xf32>
    %42 = math.exp %41 : vector<8x8xf32>
    %cst_12 = arith.constant dense<0.000000e+00> : vector<8xf32>
    %43 = vector.multi_reduction <add>, %42, %cst_12 [1] : vector<8x8xf32> to vector<8xf32>
    %44 = vector.shape_cast %43 : vector<8xf32> to vector<8x1xf32>
    %45 = tpu.reciprocal %44 {approx = true} : vector<8x1xf32> -> vector<8x1xf32>
    %46 = vector.broadcast %45 : vector<8x1xf32> to vector<8x8xf32>
    %47 = arith.mulf %42, %46 : vector<8x8xf32>
    %48 = arith.truncf %47 : vector<8x8xf32> to vector<8x8xbf16>
    %cst_13 = arith.constant dense<0.000000e+00> : vector<8x8xf32>
    %49 = tpu.matmul %48, %34, %cst_13 {dimension_numbers = #tpu.dot_dimension_numbers<[1], [0], [0], [1], [0, 0, 1, 1], [], []>} : vector<8x8xbf16>, vector<8x8xbf16>, vector<8x8xf32> -> vector<8x8xf32>
    %50 = vector.extract_strided_slice %1 {offsets = [0, 16], sizes = [8, 8], strides = [1, 1]} : vector<8x96xf32> to vector<8x8xf32>
    %cst_14 = arith.constant 0.353553385 : f32
    %51 = vector.broadcast %cst_14 : f32 to vector<8x8xf32>
    %52 = arith.mulf %50, %51 : vector<8x8xf32>
    %53 = arith.truncf %52 : vector<8x8xf32> to vector<8x8xbf16>
    %54 = vector.extract_strided_slice %1 {offsets = [0, 48], sizes = [8, 8], strides = [1, 1]} : vector<8x96xf32> to vector<8x8xf32>
    %55 = arith.truncf %54 : vector<8x8xf32> to vector<8x8xbf16>
    %56 = vector.extract_strided_slice %1 {offsets = [0, 80], sizes = [8, 8], strides = [1, 1]} : vector<8x96xf32> to vector<8x8xf32>
    %57 = arith.truncf %56 : vector<8x8xf32> to vector<8x8xbf16>
    %cst_15 = arith.constant dense<0.000000e+00> : vector<8x8xf32>
    %58 = tpu.matmul %53, %55, %cst_15 {dimension_numbers = #tpu.dot_dimension_numbers<[1], [1], [0], [0], [0, 0, 1, 0], [], []>} : vector<8x8xbf16>, vector<8x8xbf16>, vector<8x8xf32> -> vector<8x8xf32>
    %59 = vector.broadcast %3 : vector<1x8xf32> to vector<8x8xf32>
    %60 = arith.addf %58, %59 : vector<8x8xf32>
    %cst_16 = arith.constant dense<0xFF800000> : vector<8xf32>
    %61 = vector.multi_reduction <maximumf>, %60, %cst_16 [1] : vector<8x8xf32> to vector<8xf32>
    %62 = vector.shape_cast %61 : vector<8xf32> to vector<8x1xf32>
    %63 = vector.broadcast %62 : vector<8x1xf32> to vector<8x8xf32>
    %64 = arith.subf %60, %63 : vector<8x8xf32>
    %65 = math.exp %64 : vector<8x8xf32>
    %cst_17 = arith.constant dense<0.000000e+00> : vector<8xf32>
    %66 = vector.multi_reduction <add>, %65, %cst_17 [1] : vector<8x8xf32> to vector<8xf32>
    %67 = vector.shape_cast %66 : vector<8xf32> to vector<8x1xf32>
    %68 = tpu.reciprocal %67 {approx = true} : vector<8x1xf32> -> vector<8x1xf32>
    %69 = vector.broadcast %68 : vector<8x1xf32> to vector<8x8xf32>
    %70 = arith.mulf %65, %69 : vector<8x8xf32>
    %71 = arith.truncf %70 : vector<8x8xf32> to vector<8x8xbf16>
    %cst_18 = arith.constant dense<0.000000e+00> : vector<8x8xf32>
    %72 = tpu.matmul %71, %57, %cst_18 {dimension_numbers = #tpu.dot_dimension_numbers<[1], [0], [0], [1], [0, 0, 1, 1], [], []>} : vector<8x8xbf16>, vector<8x8xbf16>, vector<8x8xf32> -> vector<8x8xf32>
    %73 = vector.extract_strided_slice %1 {offsets = [0, 24], sizes = [8, 8], strides = [1, 1]} : vector<8x96xf32> to vector<8x8xf32>
    %cst_19 = arith.constant 0.353553385 : f32
    %74 = vector.broadcast %cst_19 : f32 to vector<8x8xf32>
    %75 = arith.mulf %73, %74 : vector<8x8xf32>
    %76 = arith.truncf %75 : vector<8x8xf32> to vector<8x8xbf16>
    %77 = vector.extract_strided_slice %1 {offsets = [0, 56], sizes = [8, 8], strides = [1, 1]} : vector<8x96xf32> to vector<8x8xf32>
    %78 = arith.truncf %77 : vector<8x8xf32> to vector<8x8xbf16>
    %79 = vector.extract_strided_slice %1 {offsets = [0, 88], sizes = [8, 8], strides = [1, 1]} : vector<8x96xf32> to vector<8x8xf32>
    %80 = arith.truncf %79 : vector<8x8xf32> to vector<8x8xbf16>
    %cst_20 = arith.constant dense<0.000000e+00> : vector<8x8xf32>
    %81 = tpu.matmul %76, %78, %cst_20 {dimension_numbers = #tpu.dot_dimension_numbers<[1], [1], [0], [0], [0, 0, 1, 0], [], []>} : vector<8x8xbf16>, vector<8x8xbf16>, vector<8x8xf32> -> vector<8x8xf32>
    %82 = vector.broadcast %3 : vector<1x8xf32> to vector<8x8xf32>
    %83 = arith.addf %81, %82 : vector<8x8xf32>
    %cst_21 = arith.constant dense<0xFF800000> : vector<8xf32>
    %84 = vector.multi_reduction <maximumf>, %83, %cst_21 [1] : vector<8x8xf32> to vector<8xf32>
    %85 = vector.shape_cast %84 : vector<8xf32> to vector<8x1xf32>
    %86 = vector.broadcast %85 : vector<8x1xf32> to vector<8x8xf32>
    %87 = arith.subf %83, %86 : vector<8x8xf32>
    %88 = math.exp %87 : vector<8x8xf32>
    %cst_22 = arith.constant dense<0.000000e+00> : vector<8xf32>
    %89 = vector.multi_reduction <add>, %88, %cst_22 [1] : vector<8x8xf32> to vector<8xf32>
    %90 = vector.shape_cast %89 : vector<8xf32> to vector<8x1xf32>
    %91 = tpu.reciprocal %90 {approx = true} : vector<8x1xf32> -> vector<8x1xf32>
    %92 = vector.broadcast %91 : vector<8x1xf32> to vector<8x8xf32>
    %93 = arith.mulf %88, %92 : vector<8x8xf32>
    %94 = arith.truncf %93 : vector<8x8xf32> to vector<8x8xbf16>
    %cst_23 = arith.constant dense<0.000000e+00> : vector<8x8xf32>
    %95 = tpu.matmul %94, %80, %cst_23 {dimension_numbers = #tpu.dot_dimension_numbers<[1], [0], [0], [1], [0, 0, 1, 1], [], []>} : vector<8x8xbf16>, vector<8x8xbf16>, vector<8x8xf32> -> vector<8x8xf32>
    %96 = tpu.concatenate %26, %49, %72, %95 in 1 : vector<8x8xf32>, vector<8x8xf32>, vector<8x8xf32>, vector<8x8xf32> -> vector<8x32xf32>
    %c0_24 = arith.constant 0 : index
    %c0_25 = arith.constant 0 : index
    %c0_26 = arith.constant 0 : index
    %97 = vector.load %arg3[%c0_24, %c0_25, %c0_26] : memref<1x8x32xf32, #tpu.memory_space<vmem>>, vector<1x8x32xf32>
    %98 = vector.shape_cast %97 : vector<1x8x32xf32> to vector<8x32xf32>
    %99 = vector.shape_cast %96 : vector<8x32xf32> to vector<1x8x32xf32>
    tpu.vector_store %arg3[%c0_24, %c0_25, %c0_26], %99 {strides = array<i32>} : memref<1x8x32xf32, #tpu.memory_space<vmem>>, vector<1x8x32xf32>,
    return
  }
  func.func @transform_0(%arg0: i32) -> (i32, i32, i32) {
    %c0_i32 = arith.constant 0 : i32
    %c0_i32_0 = arith.constant 0 : i32
    %c0_i32_1 = arith.constant 0 : i32
    return %arg0, %c0_i32, %c0_i32_0 : i32, i32, i32
  }
  func.func @transform_1(%arg0: i32) -> (i32, i32, i32) {
    %c0_i32 = arith.constant 0 : i32
    %c0_i32_0 = arith.constant 0 : i32
    %c0_i32_1 = arith.constant 0 : i32
    return %arg0, %c0_i32, %c0_i32_0 : i32, i32, i32
  }
  func.func @transform_2(%arg0: i32) -> (i32, i32, i32) {
    %c0_i32 = arith.constant 0 : i32
    %c0_i32_0 = arith.constant 0 : i32
    %c0_i32_1 = arith.constant 0 : i32
    return %arg0, %c0_i32, %c0_i32_0 : i32, i32, i32
  }
}

module attributes {stable_mosaic.version = 11 : i64} {
  func.func @_ln_kernel(%arg0: i32, %arg1: memref<16x32xf32, #tpu.memory_space<vmem>>, %arg2: memref<1x32xf32, #tpu.memory_space<vmem>>, %arg3: memref<1x32xf32, #tpu.memory_space<vmem>>, %arg4: memref<16x32xf32, #tpu.memory_space<vmem>>) attributes {dimension_semantics = [#tpu.dimension_semantics<parallel>], iteration_bounds = array<i64: 1>, scalar_prefetch = 0 : i64, scratch_operands = 0 : i64, tpu.core_type = #tpu.core_type<tc>, window_params = [{transform_indices = @transform_0, window_bounds = array<i64: 16, 32>}, {pipeline_mode = #tpu.pipeline_mode<synchronous>, transform_indices = @transform_1, window_bounds = array<i64: 1, 32>}, {pipeline_mode = #tpu.pipeline_mode<synchronous>, transform_indices = @transform_2, window_bounds = array<i64: 1, 32>}, {transform_indices = @transform_3, window_bounds = array<i64: 16, 32>}]} {
    %c0 = arith.constant 0 : index
    %c0_0 = arith.constant 0 : index
    %0 = vector.load %arg1[%c0, %c0_0] : memref<16x32xf32, #tpu.memory_space<vmem>>, vector<16x32xf32>
    %cst = arith.constant dense<0.000000e+00> : vector<16xf32>
    %1 = vector.multi_reduction <add>, %0, %cst [1] : vector<16x32xf32> to vector<16xf32>
    %2 = vector.shape_cast %1 : vector<16xf32> to vector<16x1xf32>
    %cst_1 = arith.constant 3.200000e+01 : f32
    %3 = vector.broadcast %cst_1 : f32 to vector<16x1xf32>
    %4 = arith.divf %2, %3 : vector<16x1xf32>
    %5 = vector.broadcast %4 : vector<16x1xf32> to vector<16x32xf32>
    %6 = arith.subf %0, %5 : vector<16x32xf32>
    %7 = arith.mulf %6, %6 : vector<16x32xf32>
    %cst_2 = arith.constant dense<0.000000e+00> : vector<16xf32>
    %8 = vector.multi_reduction <add>, %7, %cst_2 [1] : vector<16x32xf32> to vector<16xf32>
    %9 = vector.shape_cast %8 : vector<16xf32> to vector<16x1xf32>
    %cst_3 = arith.constant 3.200000e+01 : f32
    %10 = vector.broadcast %cst_3 : f32 to vector<16x1xf32>
    %11 = arith.divf %9, %10 : vector<16x1xf32>
    %12 = vector.broadcast %4 : vector<16x1xf32> to vector<16x32xf32>
    %13 = arith.subf %0, %12 : vector<16x32xf32>
    %cst_4 = arith.constant 9.99999974E-6 : f32
    %14 = vector.broadcast %cst_4 : f32 to vector<16x1xf32>
    %15 = arith.addf %11, %14 : vector<16x1xf32>
    %16 = math.rsqrt %15 : vector<16x1xf32>
    %17 = vector.broadcast %16 : vector<16x1xf32> to vector<16x32xf32>
    %18 = arith.mulf %13, %17 : vector<16x32xf32>
    %c0_5 = arith.constant 0 : index
    %c0_6 = arith.constant 0 : index
    %19 = vector.load %arg2[%c0_5, %c0_6] : memref<1x32xf32, #tpu.memory_space<vmem>>, vector<1x32xf32>
    %20 = vector.broadcast %19 : vector<1x32xf32> to vector<16x32xf32>
    %21 = arith.mulf %18, %20 : vector<16x32xf32>
    %c0_7 = arith.constant 0 : index
    %c0_8 = arith.constant 0 : index
    %22 = vector.load %arg3[%c0_7, %c0_8] : memref<1x32xf32, #tpu.memory_space<vmem>>, vector<1x32xf32>
    %23 = vector.broadcast %22 : vector<1x32xf32> to vector<16x32xf32>
    %24 = arith.addf %21, %23 : vector<16x32xf32>
    %c0_9 = arith.constant 0 : index
    %c0_10 = arith.constant 0 : index
    %25 = vector.load %arg4[%c0_9, %c0_10] : memref<16x32xf32, #tpu.memory_space<vmem>>, vector<16x32xf32>
    tpu.vector_store %arg4[%c0_9, %c0_10], %24 {strides = array<i32>} : memref<16x32xf32, #tpu.memory_space<vmem>>, vector<16x32xf32>,
    return
  }
  func.func @transform_0(%arg0: i32) -> (i32, i32) {
    %c0_i32 = arith.constant 0 : i32
    %c0_i32_0 = arith.constant 0 : i32
    return %arg0, %c0_i32 : i32, i32
  }
  func.func @transform_1(%arg0: i32) -> (i32, i32) {
    %c0_i32 = arith.constant 0 : i32
    %c0_i32_0 = arith.constant 0 : i32
    %c0_i32_1 = arith.constant 0 : i32
    return %c0_i32, %c0_i32_0 : i32, i32
  }
  func.func @transform_2(%arg0: i32) -> (i32, i32) {
    %c0_i32 = arith.constant 0 : i32
    %c0_i32_0 = arith.constant 0 : i32
    %c0_i32_1 = arith.constant 0 : i32
    return %c0_i32, %c0_i32_0 : i32, i32
  }
  func.func @transform_3(%arg0: i32) -> (i32, i32) {
    %c0_i32 = arith.constant 0 : i32
    %c0_i32_0 = arith.constant 0 : i32
    return %arg0, %c0_i32 : i32, i32
  }
}

module attributes {stable_mosaic.version = 11 : i64} {
  func.func @_dense_kernel(%arg0: i32, %arg1: i32, %arg2: i32, %arg3: memref<16x32xf32, #tpu.memory_space<vmem>>, %arg4: memref<32x64xf32, #tpu.memory_space<vmem>>, %arg5: memref<1x64xf32, #tpu.memory_space<vmem>>, %arg6: memref<16x64xf32, #tpu.memory_space<vmem>>, %arg7: memref<16x64xf32, #tpu.memory_space<vmem>>) attributes {dimension_semantics = [#tpu.dimension_semantics<parallel>, #tpu.dimension_semantics<parallel>, #tpu.dimension_semantics<arbitrary>], iteration_bounds = array<i64: 1, 1, 1>, scalar_prefetch = 0 : i64, scratch_operands = 1 : i64, tpu.core_type = #tpu.core_type<tc>, window_params = [{transform_indices = @transform_0, window_bounds = array<i64: 16, 32>}, {transform_indices = @transform_1, window_bounds = array<i64: 32, 64>}, {transform_indices = @transform_2, window_bounds = array<i64: 1, 64>}, {transform_indices = @transform_3, window_bounds = array<i64: 16, 64>}]} {
    %c0_i32 = arith.constant 0 : i32
    %0 = arith.cmpi eq, %arg2, %c0_i32 : i32
    %1 = arith.extui %0 : i1 to i32
    %c0_i32_0 = arith.constant 0 : i32
    %2 = arith.cmpi ne, %1, %c0_i32_0 : i32
    scf.if %2 {
      %cst_10 = arith.constant 0.000000e+00 : f32
      %14 = vector.broadcast %cst_10 : f32 to vector<16x64xf32>
      %c0_11 = arith.constant 0 : index
      %c0_12 = arith.constant 0 : index
      %15 = vector.load %arg7[%c0_11, %c0_12] : memref<16x64xf32, #tpu.memory_space<vmem>>, vector<16x64xf32>
      tpu.vector_store %arg7[%c0_11, %c0_12], %14 {strides = array<i32>} : memref<16x64xf32, #tpu.memory_space<vmem>>, vector<16x64xf32>,
    } else {
    }
    %c0 = arith.constant 0 : index
    %c0_1 = arith.constant 0 : index
    %3 = vector.load %arg7[%c0, %c0_1] : memref<16x64xf32, #tpu.memory_space<vmem>>, vector<16x64xf32>
    %c0_2 = arith.constant 0 : index
    %c0_3 = arith.constant 0 : index
    %4 = vector.load %arg3[%c0_2, %c0_3] : memref<16x32xf32, #tpu.memory_space<vmem>>, vector<16x32xf32>
    %5 = arith.truncf %4 : vector<16x32xf32> to vector<16x32xbf16>
    %c0_4 = arith.constant 0 : index
    %c0_5 = arith.constant 0 : index
    %6 = vector.load %arg4[%c0_4, %c0_5] : memref<32x64xf32, #tpu.memory_space<vmem>>, vector<32x64xf32>
    %7 = arith.truncf %6 : vector<32x64xf32> to vector<32x64xbf16>
    %cst = arith.constant dense<0.000000e+00> : vector<16x64xf32>
    %8 = tpu.matmul %5, %7, %cst {dimension_numbers = #tpu.dot_dimension_numbers<[1], [0], [0], [1], [0, 0, 1, 1], [], []>} : vector<16x32xbf16>, vector<32x64xbf16>, vector<16x64xf32> -> vector<16x64xf32>
    %9 = arith.addf %3, %8 : vector<16x64xf32>
    %c0_6 = arith.constant 0 : index
    %c0_7 = arith.constant 0 : index
    %10 = vector.load %arg7[%c0_6, %c0_7] : memref<16x64xf32, #tpu.memory_space<vmem>>, vector<16x64xf32>
    tpu.vector_store %arg7[%c0_6, %c0_7], %9 {strides = array<i32>} : memref<16x64xf32, #tpu.memory_space<vmem>>, vector<16x64xf32>,
    %c0_i32_8 = arith.constant 0 : i32
    %11 = arith.cmpi eq, %arg2, %c0_i32_8 : i32
    %12 = arith.extui %11 : i1 to i32
    %c0_i32_9 = arith.constant 0 : i32
    %13 = arith.cmpi ne, %12, %c0_i32_9 : i32
    scf.if %13 {
      %c0_10 = arith.constant 0 : index
      %c0_11 = arith.constant 0 : index
      %14 = vector.load %arg7[%c0_10, %c0_11] : memref<16x64xf32, #tpu.memory_space<vmem>>, vector<16x64xf32>
      %c0_12 = arith.constant 0 : index
      %c0_13 = arith.constant 0 : index
      %15 = vector.load %arg5[%c0_12, %c0_13] : memref<1x64xf32, #tpu.memory_space<vmem>>, vector<1x64xf32>
      %16 = vector.broadcast %15 : vector<1x64xf32> to vector<16x64xf32>
      %17 = arith.addf %14, %16 : vector<16x64xf32>
      %cst_14 = arith.constant 5.000000e-01 : f32
      %18 = vector.broadcast %cst_14 : f32 to vector<16x64xf32>
      %19 = arith.mulf %18, %17 : vector<16x64xf32>
      %cst_15 = arith.constant 0.707106769 : f32
      %20 = vector.broadcast %cst_15 : f32 to vector<16x64xf32>
      %21 = arith.mulf %17, %20 : vector<16x64xf32>
      %22 = math.erf %21 : vector<16x64xf32>
      %cst_16 = arith.constant 1.000000e+00 : f32
      %23 = vector.broadcast %cst_16 : f32 to vector<16x64xf32>
      %24 = arith.addf %23, %22 : vector<16x64xf32>
      %25 = arith.mulf %19, %24 : vector<16x64xf32>
      %c0_17 = arith.constant 0 : index
      %c0_18 = arith.constant 0 : index
      %26 = vector.load %arg6[%c0_17, %c0_18] : memref<16x64xf32, #tpu.memory_space<vmem>>, vector<16x64xf32>
      tpu.vector_store %arg6[%c0_17, %c0_18], %25 {strides = array<i32>} : memref<16x64xf32, #tpu.memory_space<vmem>>, vector<16x64xf32>,
    } else {
    }
    return
  }
  func.func @transform_0(%arg0: i32, %arg1: i32, %arg2: i32) -> (i32, i32) {
    %c0_i32 = arith.constant 0 : i32
    return %arg0, %arg2 : i32, i32
  }
  func.func @transform_1(%arg0: i32, %arg1: i32, %arg2: i32) -> (i32, i32) {
    %c0_i32 = arith.constant 0 : i32
    return %arg2, %arg1 : i32, i32
  }
  func.func @transform_2(%arg0: i32, %arg1: i32, %arg2: i32) -> (i32, i32) {
    %c0_i32 = arith.constant 0 : i32
    %c0_i32_0 = arith.constant 0 : i32
    return %c0_i32, %arg1 : i32, i32
  }
  func.func @transform_3(%arg0: i32, %arg1: i32, %arg2: i32) -> (i32, i32) {
    %c0_i32 = arith.constant 0 : i32
    return %arg0, %arg1 : i32, i32
  }
}

module attributes {stable_mosaic.version = 11 : i64} {
  func.func @kernel(%arg0: i32, %arg1: i32, %arg2: memref<16x32xf32, #tpu.memory_space<vmem>>, %arg3: memref<32x32xf32, #tpu.memory_space<vmem>>, %arg4: memref<1x32xf32, #tpu.memory_space<vmem>>, %arg5: memref<1x32xf32, #tpu.memory_space<vmem>>, %arg6: memref<1x32xf32, #tpu.memory_space<vmem>>, %arg7: memref<16x32xf32, #tpu.memory_space<vmem>>, %arg8: memref<16x32xf32, #tpu.memory_space<vmem>>) attributes {dimension_semantics = [#tpu.dimension_semantics<parallel>, #tpu.dimension_semantics<arbitrary>], iteration_bounds = array<i64: 1, 1>, scalar_prefetch = 0 : i64, scratch_operands = 1 : i64, tpu.core_type = #tpu.core_type<tc>, window_params = [{transform_indices = @transform_0, window_bounds = array<i64: 16, 32>}, {transform_indices = @transform_1, window_bounds = array<i64: 32, 32>}, {pipeline_mode = #tpu.pipeline_mode<synchronous>, transform_indices = @transform_2, window_bounds = array<i64: 1, 32>}, {pipeline_mode = #tpu.pipeline_mode<synchronous>, transform_indices = @transform_3, window_bounds = array<i64: 1, 32>}, {pipeline_mode = #tpu.pipeline_mode<synchronous>, transform_indices = @transform_4, window_bounds = array<i64: 1, 32>}, {transform_indices = @transform_5, window_bounds = array<i64: 16, 32>}]} {
    %c0_i32 = arith.constant 0 : i32
    %0 = arith.cmpi eq, %arg1, %c0_i32 : i32
    %1 = arith.extui %0 : i1 to i32
    %c0_i32_0 = arith.constant 0 : i32
    %2 = arith.cmpi ne, %1, %c0_i32_0 : i32
    scf.if %2 {
      %cst_10 = arith.constant 0.000000e+00 : f32
      %14 = vector.broadcast %cst_10 : f32 to vector<16x32xf32>
      %c0_11 = arith.constant 0 : index
      %c0_12 = arith.constant 0 : index
      %15 = vector.load %arg8[%c0_11, %c0_12] : memref<16x32xf32, #tpu.memory_space<vmem>>, vector<16x32xf32>
      tpu.vector_store %arg8[%c0_11, %c0_12], %14 {strides = array<i32>} : memref<16x32xf32, #tpu.memory_space<vmem>>, vector<16x32xf32>,
    } else {
    }
    %c0 = arith.constant 0 : index
    %c0_1 = arith.constant 0 : index
    %3 = vector.load %arg8[%c0, %c0_1] : memref<16x32xf32, #tpu.memory_space<vmem>>, vector<16x32xf32>
    %c0_2 = arith.constant 0 : index
    %c0_3 = arith.constant 0 : index
    %4 = vector.load %arg2[%c0_2, %c0_3] : memref<16x32xf32, #tpu.memory_space<vmem>>, vector<16x32xf32>
    %5 = arith.truncf %4 : vector<16x32xf32> to vector<16x32xbf16>
    %c0_4 = arith.constant 0 : index
    %c0_5 = arith.constant 0 : index
    %6 = vector.load %arg3[%c0_4, %c0_5] : memref<32x32xf32, #tpu.memory_space<vmem>>, vector<32x32xf32>
    %7 = arith.truncf %6 : vector<32x32xf32> to vector<32x32xbf16>
    %cst = arith.constant dense<0.000000e+00> : vector<16x32xf32>
    %8 = tpu.matmul %5, %7, %cst {dimension_numbers = #tpu.dot_dimension_numbers<[1], [0], [0], [1], [0, 0, 1, 1], [], []>} : vector<16x32xbf16>, vector<32x32xbf16>, vector<16x32xf32> -> vector<16x32xf32>
    %9 = arith.addf %3, %8 : vector<16x32xf32>
    %c0_6 = arith.constant 0 : index
    %c0_7 = arith.constant 0 : index
    %10 = vector.load %arg8[%c0_6, %c0_7] : memref<16x32xf32, #tpu.memory_space<vmem>>, vector<16x32xf32>
    tpu.vector_store %arg8[%c0_6, %c0_7], %9 {strides = array<i32>} : memref<16x32xf32, #tpu.memory_space<vmem>>, vector<16x32xf32>,
    %c0_i32_8 = arith.constant 0 : i32
    %11 = arith.cmpi eq, %arg1, %c0_i32_8 : i32
    %12 = arith.extui %11 : i1 to i32
    %c0_i32_9 = arith.constant 0 : i32
    %13 = arith.cmpi ne, %12, %c0_i32_9 : i32
    scf.if %13 {
      %c0_10 = arith.constant 0 : index
      %c0_11 = arith.constant 0 : index
      %14 = vector.load %arg8[%c0_10, %c0_11] : memref<16x32xf32, #tpu.memory_space<vmem>>, vector<16x32xf32>
      %c0_12 = arith.constant 0 : index
      %c0_13 = arith.constant 0 : index
      %15 = vector.load %arg4[%c0_12, %c0_13] : memref<1x32xf32, #tpu.memory_space<vmem>>, vector<1x32xf32>
      %16 = vector.broadcast %15 : vector<1x32xf32> to vector<16x32xf32>
      %17 = arith.addf %14, %16 : vector<16x32xf32>
      %cst_14 = arith.constant 5.000000e-01 : f32
      %18 = vector.broadcast %cst_14 : f32 to vector<16x32xf32>
      %19 = arith.mulf %18, %17 : vector<16x32xf32>
      %cst_15 = arith.constant 0.707106769 : f32
      %20 = vector.broadcast %cst_15 : f32 to vector<16x32xf32>
      %21 = arith.mulf %17, %20 : vector<16x32xf32>
      %22 = math.erf %21 : vector<16x32xf32>
      %cst_16 = arith.constant 1.000000e+00 : f32
      %23 = vector.broadcast %cst_16 : f32 to vector<16x32xf32>
      %24 = arith.addf %23, %22 : vector<16x32xf32>
      %25 = arith.mulf %19, %24 : vector<16x32xf32>
      %cst_17 = arith.constant dense<0.000000e+00> : vector<16xf32>
      %26 = vector.multi_reduction <add>, %25, %cst_17 [1] : vector<16x32xf32> to vector<16xf32>
      %27 = vector.shape_cast %26 : vector<16xf32> to vector<16x1xf32>
      %cst_18 = arith.constant 3.200000e+01 : f32
      %28 = vector.broadcast %cst_18 : f32 to vector<16x1xf32>
      %29 = arith.divf %27, %28 : vector<16x1xf32>
      %30 = vector.broadcast %29 : vector<16x1xf32> to vector<16x32xf32>
      %31 = arith.subf %25, %30 : vector<16x32xf32>
      %32 = arith.mulf %31, %31 : vector<16x32xf32>
      %cst_19 = arith.constant dense<0.000000e+00> : vector<16xf32>
      %33 = vector.multi_reduction <add>, %32, %cst_19 [1] : vector<16x32xf32> to vector<16xf32>
      %34 = vector.shape_cast %33 : vector<16xf32> to vector<16x1xf32>
      %cst_20 = arith.constant 3.200000e+01 : f32
      %35 = vector.broadcast %cst_20 : f32 to vector<16x1xf32>
      %36 = arith.divf %34, %35 : vector<16x1xf32>
      %37 = vector.broadcast %29 : vector<16x1xf32> to vector<16x32xf32>
      %38 = arith.subf %25, %37 : vector<16x32xf32>
      %cst_21 = arith.constant 9.99999974E-6 : f32
      %39 = vector.broadcast %cst_21 : f32 to vector<16x1xf32>
      %40 = arith.addf %36, %39 : vector<16x1xf32>
      %41 = math.rsqrt %40 : vector<16x1xf32>
      %42 = vector.broadcast %41 : vector<16x1xf32> to vector<16x32xf32>
      %43 = arith.mulf %38, %42 : vector<16x32xf32>
      %c0_22 = arith.constant 0 : index
      %c0_23 = arith.constant 0 : index
      %44 = vector.load %arg5[%c0_22, %c0_23] : memref<1x32xf32, #tpu.memory_space<vmem>>, vector<1x32xf32>
      %45 = vector.broadcast %44 : vector<1x32xf32> to vector<16x32xf32>
      %46 = arith.mulf %43, %45 : vector<16x32xf32>
      %c0_24 = arith.constant 0 : index
      %c0_25 = arith.constant 0 : index
      %47 = vector.load %arg6[%c0_24, %c0_25] : memref<1x32xf32, #tpu.memory_space<vmem>>, vector<1x32xf32>
      %48 = vector.broadcast %47 : vector<1x32xf32> to vector<16x32xf32>
      %49 = arith.addf %46, %48 : vector<16x32xf32>
      %c0_26 = arith.constant 0 : index
      %c0_27 = arith.constant 0 : index
      %50 = vector.load %arg7[%c0_26, %c0_27] : memref<16x32xf32, #tpu.memory_space<vmem>>, vector<16x32xf32>
      tpu.vector_store %arg7[%c0_26, %c0_27], %49 {strides = array<i32>} : memref<16x32xf32, #tpu.memory_space<vmem>>, vector<16x32xf32>,
    } else {
    }
    return
  }
  func.func @transform_0(%arg0: i32, %arg1: i32) -> (i32, i32) {
    %c0_i32 = arith.constant 0 : i32
    return %arg0, %arg1 : i32, i32
  }
  func.func @transform_1(%arg0: i32, %arg1: i32) -> (i32, i32) {
    %c0_i32 = arith.constant 0 : i32
    %c0_i32_0 = arith.constant 0 : i32
    return %arg1, %c0_i32 : i32, i32
  }
  func.func @transform_2(%arg0: i32, %arg1: i32) -> (i32, i32) {
    %c0_i32 = arith.constant 0 : i32
    %c0_i32_0 = arith.constant 0 : i32
    %c0_i32_1 = arith.constant 0 : i32
    return %c0_i32, %c0_i32_0 : i32, i32
  }
  func.func @transform_3(%arg0: i32, %arg1: i32) -> (i32, i32) {
    %c0_i32 = arith.constant 0 : i32
    %c0_i32_0 = arith.constant 0 : i32
    %c0_i32_1 = arith.constant 0 : i32
    return %c0_i32, %c0_i32_0 : i32, i32
  }
  func.func @transform_4(%arg0: i32, %arg1: i32) -> (i32, i32) {
    %c0_i32 = arith.constant 0 : i32
    %c0_i32_0 = arith.constant 0 : i32
    %c0_i32_1 = arith.constant 0 : i32
    return %c0_i32, %c0_i32_0 : i32, i32
  }
  func.func @transform_5(%arg0: i32, %arg1: i32) -> (i32, i32) {
    %c0_i32 = arith.constant 0 : i32
    %c0_i32_0 = arith.constant 0 : i32
    return %arg0, %c0_i32 : i32, i32
  }
}

module attributes {stable_mosaic.version = 11 : i64} {
  func.func @_dense_kernel(%arg0: i32, %arg1: i32, %arg2: i32, %arg3: memref<16x32xf32, #tpu.memory_space<vmem>>, %arg4: memref<32x64xf32, #tpu.memory_space<vmem>>, %arg5: memref<1x64xf32, #tpu.memory_space<vmem>>, %arg6: memref<16x64xf32, #tpu.memory_space<vmem>>, %arg7: memref<16x64xf32, #tpu.memory_space<vmem>>) attributes {dimension_semantics = [#tpu.dimension_semantics<parallel>, #tpu.dimension_semantics<parallel>, #tpu.dimension_semantics<arbitrary>], iteration_bounds = array<i64: 1, 1, 1>, scalar_prefetch = 0 : i64, scratch_operands = 1 : i64, tpu.core_type = #tpu.core_type<tc>, window_params = [{transform_indices = @transform_0, window_bounds = array<i64: 16, 32>}, {transform_indices = @transform_1, window_bounds = array<i64: 32, 64>}, {transform_indices = @transform_2, window_bounds = array<i64: 1, 64>}, {transform_indices = @transform_3, window_bounds = array<i64: 16, 64>}]} {
    %c0_i32 = arith.constant 0 : i32
    %0 = arith.cmpi eq, %arg2, %c0_i32 : i32
    %1 = arith.extui %0 : i1 to i32
    %c0_i32_0 = arith.constant 0 : i32
    %2 = arith.cmpi ne, %1, %c0_i32_0 : i32
    scf.if %2 {
      %cst_10 = arith.constant 0.000000e+00 : f32
      %14 = vector.broadcast %cst_10 : f32 to vector<16x64xf32>
      %c0_11 = arith.constant 0 : index
      %c0_12 = arith.constant 0 : index
      %15 = vector.load %arg7[%c0_11, %c0_12] : memref<16x64xf32, #tpu.memory_space<vmem>>, vector<16x64xf32>
      tpu.vector_store %arg7[%c0_11, %c0_12], %14 {strides = array<i32>} : memref<16x64xf32, #tpu.memory_space<vmem>>, vector<16x64xf32>,
    } else {
    }
    %c0 = arith.constant 0 : index
    %c0_1 = arith.constant 0 : index
    %3 = vector.load %arg7[%c0, %c0_1] : memref<16x64xf32, #tpu.memory_space<vmem>>, vector<16x64xf32>
    %c0_2 = arith.constant 0 : index
    %c0_3 = arith.constant 0 : index
    %4 = vector.load %arg3[%c0_2, %c0_3] : memref<16x32xf32, #tpu.memory_space<vmem>>, vector<16x32xf32>
    %5 = arith.truncf %4 : vector<16x32xf32> to vector<16x32xbf16>
    %c0_4 = arith.constant 0 : index
    %c0_5 = arith.constant 0 : index
    %6 = vector.load %arg4[%c0_4, %c0_5] : memref<32x64xf32, #tpu.memory_space<vmem>>, vector<32x64xf32>
    %7 = arith.truncf %6 : vector<32x64xf32> to vector<32x64xbf16>
    %cst = arith.constant dense<0.000000e+00> : vector<16x64xf32>
    %8 = tpu.matmul %5, %7, %cst {dimension_numbers = #tpu.dot_dimension_numbers<[1], [0], [0], [1], [0, 0, 1, 1], [], []>} : vector<16x32xbf16>, vector<32x64xbf16>, vector<16x64xf32> -> vector<16x64xf32>
    %9 = arith.addf %3, %8 : vector<16x64xf32>
    %c0_6 = arith.constant 0 : index
    %c0_7 = arith.constant 0 : index
    %10 = vector.load %arg7[%c0_6, %c0_7] : memref<16x64xf32, #tpu.memory_space<vmem>>, vector<16x64xf32>
    tpu.vector_store %arg7[%c0_6, %c0_7], %9 {strides = array<i32>} : memref<16x64xf32, #tpu.memory_space<vmem>>, vector<16x64xf32>,
    %c0_i32_8 = arith.constant 0 : i32
    %11 = arith.cmpi eq, %arg2, %c0_i32_8 : i32
    %12 = arith.extui %11 : i1 to i32
    %c0_i32_9 = arith.constant 0 : i32
    %13 = arith.cmpi ne, %12, %c0_i32_9 : i32
    scf.if %13 {
      %c0_10 = arith.constant 0 : index
      %c0_11 = arith.constant 0 : index
      %14 = vector.load %arg7[%c0_10, %c0_11] : memref<16x64xf32, #tpu.memory_space<vmem>>, vector<16x64xf32>
      %c0_12 = arith.constant 0 : index
      %c0_13 = arith.constant 0 : index
      %15 = vector.load %arg5[%c0_12, %c0_13] : memref<1x64xf32, #tpu.memory_space<vmem>>, vector<1x64xf32>
      %16 = vector.broadcast %15 : vector<1x64xf32> to vector<16x64xf32>
      %17 = arith.addf %14, %16 : vector<16x64xf32>
      %c0_14 = arith.constant 0 : index
      %c0_15 = arith.constant 0 : index
      %18 = vector.load %arg6[%c0_14, %c0_15] : memref<16x64xf32, #tpu.memory_space<vmem>>, vector<16x64xf32>
      tpu.vector_store %arg6[%c0_14, %c0_15], %17 {strides = array<i32>} : memref<16x64xf32, #tpu.memory_space<vmem>>, vector<16x64xf32>,
    } else {
    }
    return
  }
  func.func @transform_0(%arg0: i32, %arg1: i32, %arg2: i32) -> (i32, i32) {
    %c0_i32 = arith.constant 0 : i32
    return %arg0, %arg2 : i32, i32
  }
  func.func @transform_1(%arg0: i32, %arg1: i32, %arg2: i32) -> (i32, i32) {
    %c0_i32 = arith.constant 0 : i32
    return %arg2, %arg1 : i32, i32
  }
  func.func @transform_2(%arg0: i32, %arg1: i32, %arg2: i32) -> (i32, i32) {
    %c0_i32 = arith.constant 0 : i32
    %c0_i32_0 = arith.constant 0 : i32
    return %c0_i32, %arg1 : i32, i32
  }
  func.func @transform_3(%arg0: i32, %arg1: i32, %arg2: i32) -> (i32, i32) {
    %c0_i32 = arith.constant 0 : i32
    return %arg0, %arg1 : i32, i32
  }
}

module attributes {stable_mosaic.version = 11 : i64} {
  func.func @kernel(%arg0: i32, %arg1: i32, %arg2: memref<16x64xf32, #tpu.memory_space<vmem>>, %arg3: memref<64x32xf32, #tpu.memory_space<vmem>>, %arg4: memref<1x32xf32, #tpu.memory_space<vmem>>, %arg5: memref<16x32xf32, #tpu.memory_space<vmem>>, %arg6: memref<1x32xf32, #tpu.memory_space<vmem>>, %arg7: memref<1x32xf32, #tpu.memory_space<vmem>>, %arg8: memref<16x32xf32, #tpu.memory_space<vmem>>, %arg9: memref<16x32xf32, #tpu.memory_space<vmem>>, %arg10: memref<16x32xf32, #tpu.memory_space<vmem>>) attributes {dimension_semantics = [#tpu.dimension_semantics<parallel>, #tpu.dimension_semantics<arbitrary>], iteration_bounds = array<i64: 1, 1>, scalar_prefetch = 0 : i64, scratch_operands = 1 : i64, tpu.core_type = #tpu.core_type<tc>, window_params = [{transform_indices = @transform_0, window_bounds = array<i64: 16, 64>}, {transform_indices = @transform_1, window_bounds = array<i64: 64, 32>}, {pipeline_mode = #tpu.pipeline_mode<synchronous>, transform_indices = @transform_2, window_bounds = array<i64: 1, 32>}, {transform_indices = @transform_3, window_bounds = array<i64: 16, 32>}, {pipeline_mode = #tpu.pipeline_mode<synchronous>, transform_indices = @transform_4, window_bounds = array<i64: 1, 32>}, {pipeline_mode = #tpu.pipeline_mode<synchronous>, transform_indices = @transform_5, window_bounds = array<i64: 1, 32>}, {transform_indices = @transform_6, window_bounds = array<i64: 16, 32>}, {transform_indices = @transform_7, window_bounds = array<i64: 16, 32>}]} {
    %c0_i32 = arith.constant 0 : i32
    %0 = arith.cmpi eq, %arg1, %c0_i32 : i32
    %1 = arith.extui %0 : i1 to i32
    %c0_i32_0 = arith.constant 0 : i32
    %2 = arith.cmpi ne, %1, %c0_i32_0 : i32
    scf.if %2 {
      %cst_10 = arith.constant 0.000000e+00 : f32
      %14 = vector.broadcast %cst_10 : f32 to vector<16x32xf32>
      %c0_11 = arith.constant 0 : index
      %c0_12 = arith.constant 0 : index
      %15 = vector.load %arg10[%c0_11, %c0_12] : memref<16x32xf32, #tpu.memory_space<vmem>>, vector<16x32xf32>
      tpu.vector_store %arg10[%c0_11, %c0_12], %14 {strides = array<i32>} : memref<16x32xf32, #tpu.memory_space<vmem>>, vector<16x32xf32>,
    } else {
    }
    %c0 = arith.constant 0 : index
    %c0_1 = arith.constant 0 : index
    %3 = vector.load %arg10[%c0, %c0_1] : memref<16x32xf32, #tpu.memory_space<vmem>>, vector<16x32xf32>
    %c0_2 = arith.constant 0 : index
    %c0_3 = arith.constant 0 : index
    %4 = vector.load %arg2[%c0_2, %c0_3] : memref<16x64xf32, #tpu.memory_space<vmem>>, vector<16x64xf32>
    %5 = arith.truncf %4 : vector<16x64xf32> to vector<16x64xbf16>
    %c0_4 = arith.constant 0 : index
    %c0_5 = arith.constant 0 : index
    %6 = vector.load %arg3[%c0_4, %c0_5] : memref<64x32xf32, #tpu.memory_space<vmem>>, vector<64x32xf32>
    %7 = arith.truncf %6 : vector<64x32xf32> to vector<64x32xbf16>
    %cst = arith.constant dense<0.000000e+00> : vector<16x32xf32>
    %8 = tpu.matmul %5, %7, %cst {dimension_numbers = #tpu.dot_dimension_numbers<[1], [0], [0], [1], [0, 0, 1, 1], [], []>} : vector<16x64xbf16>, vector<64x32xbf16>, vector<16x32xf32> -> vector<16x32xf32>
    %9 = arith.addf %3, %8 : vector<16x32xf32>
    %c0_6 = arith.constant 0 : index
    %c0_7 = arith.constant 0 : index
    %10 = vector.load %arg10[%c0_6, %c0_7] : memref<16x32xf32, #tpu.memory_space<vmem>>, vector<16x32xf32>
    tpu.vector_store %arg10[%c0_6, %c0_7], %9 {strides = array<i32>} : memref<16x32xf32, #tpu.memory_space<vmem>>, vector<16x32xf32>,
    %c0_i32_8 = arith.constant 0 : i32
    %11 = arith.cmpi eq, %arg1, %c0_i32_8 : i32
    %12 = arith.extui %11 : i1 to i32
    %c0_i32_9 = arith.constant 0 : i32
    %13 = arith.cmpi ne, %12, %c0_i32_9 : i32
    scf.if %13 {
      %c0_10 = arith.constant 0 : index
      %c0_11 = arith.constant 0 : index
      %14 = vector.load %arg10[%c0_10, %c0_11] : memref<16x32xf32, #tpu.memory_space<vmem>>, vector<16x32xf32>
      %c0_12 = arith.constant 0 : index
      %c0_13 = arith.constant 0 : index
      %15 = vector.load %arg4[%c0_12, %c0_13] : memref<1x32xf32, #tpu.memory_space<vmem>>, vector<1x32xf32>
      %16 = vector.broadcast %15 : vector<1x32xf32> to vector<16x32xf32>
      %17 = arith.addf %14, %16 : vector<16x32xf32>
      %c0_14 = arith.constant 0 : index
      %c0_15 = arith.constant 0 : index
      %18 = vector.load %arg8[%c0_14, %c0_15] : memref<16x32xf32, #tpu.memory_space<vmem>>, vector<16x32xf32>
      tpu.vector_store %arg8[%c0_14, %c0_15], %17 {strides = array<i32>} : memref<16x32xf32, #tpu.memory_space<vmem>>, vector<16x32xf32>,
      %c0_16 = arith.constant 0 : index
      %c0_17 = arith.constant 0 : index
      %19 = vector.load %arg5[%c0_16, %c0_17] : memref<16x32xf32, #tpu.memory_space<vmem>>, vector<16x32xf32>
      %20 = arith.addf %17, %19 : vector<16x32xf32>
      %cst_18 = arith.constant dense<0.000000e+00> : vector<16xf32>
      %21 = vector.multi_reduction <add>, %20, %cst_18 [1] : vector<16x32xf32> to vector<16xf32>
      %22 = vector.shape_cast %21 : vector<16xf32> to vector<16x1xf32>
      %cst_19 = arith.constant 3.200000e+01 : f32
      %23 = vector.broadcast %cst_19 : f32 to vector<16x1xf32>
      %24 = arith.divf %22, %23 : vector<16x1xf32>
      %25 = vector.broadcast %24 : vector<16x1xf32> to vector<16x32xf32>
      %26 = arith.subf %20, %25 : vector<16x32xf32>
      %27 = arith.mulf %26, %26 : vector<16x32xf32>
      %cst_20 = arith.constant dense<0.000000e+00> : vector<16xf32>
      %28 = vector.multi_reduction <add>, %27, %cst_20 [1] : vector<16x32xf32> to vector<16xf32>
      %29 = vector.shape_cast %28 : vector<16xf32> to vector<16x1xf32>
      %cst_21 = arith.constant 3.200000e+01 : f32
      %30 = vector.broadcast %cst_21 : f32 to vector<16x1xf32>
      %31 = arith.divf %29, %30 : vector<16x1xf32>
      %32 = vector.broadcast %24 : vector<16x1xf32> to vector<16x32xf32>
      %33 = arith.subf %20, %32 : vector<16x32xf32>
      %cst_22 = arith.constant 9.99999974E-6 : f32
      %34 = vector.broadcast %cst_22 : f32 to vector<16x1xf32>
      %35 = arith.addf %31, %34 : vector<16x1xf32>
      %36 = math.rsqrt %35 : vector<16x1xf32>
      %37 = vector.broadcast %36 : vector<16x1xf32> to vector<16x32xf32>
      %38 = arith.mulf %33, %37 : vector<16x32xf32>
      %c0_23 = arith.constant 0 : index
      %c0_24 = arith.constant 0 : index
      %39 = vector.load %arg6[%c0_23, %c0_24] : memref<1x32xf32, #tpu.memory_space<vmem>>, vector<1x32xf32>
      %40 = vector.broadcast %39 : vector<1x32xf32> to vector<16x32xf32>
      %41 = arith.mulf %38, %40 : vector<16x32xf32>
      %c0_25 = arith.constant 0 : index
      %c0_26 = arith.constant 0 : index
      %42 = vector.load %arg7[%c0_25, %c0_26] : memref<1x32xf32, #tpu.memory_space<vmem>>, vector<1x32xf32>
      %43 = vector.broadcast %42 : vector<1x32xf32> to vector<16x32xf32>
      %44 = arith.addf %41, %43 : vector<16x32xf32>
      %c0_27 = arith.constant 0 : index
      %c0_28 = arith.constant 0 : index
      %45 = vector.load %arg9[%c0_27, %c0_28] : memref<16x32xf32, #tpu.memory_space<vmem>>, vector<16x32xf32>
      tpu.vector_store %arg9[%c0_27, %c0_28], %44 {strides = array<i32>} : memref<16x32xf32, #tpu.memory_space<vmem>>, vector<16x32xf32>,
    } else {
    }
    return
  }
  func.func @transform_0(%arg0: i32, %arg1: i32) -> (i32, i32) {
    %c0_i32 = arith.constant 0 : i32
    return %arg0, %arg1 : i32, i32
  }
  func.func @transform_1(%arg0: i32, %arg1: i32) -> (i32, i32) {
    %c0_i32 = arith.constant 0 : i32
    %c0_i32_0 = arith.constant 0 : i32
    return %arg1, %c0_i32 : i32, i32
  }
  func.func @transform_2(%arg0: i32, %arg1: i32) -> (i32, i32) {
    %c0_i32 = arith.constant 0 : i32
    %c0_i32_0 = arith.constant 0 : i32
    %c0_i32_1 = arith.constant 0 : i32
    return %c0_i32, %c0_i32_0 : i32, i32
  }
  func.func @transform_3(%arg0: i32, %arg1: i32) -> (i32, i32) {
    %c0_i32 = arith.constant 0 : i32
    %c0_i32_0 = arith.constant 0 : i32
    return %arg0, %c0_i32 : i32, i32
  }
  func.func @transform_4(%arg0: i32, %arg1: i32) -> (i32, i32) {
    %c0_i32 = arith.constant 0 : i32
    %c0_i32_0 = arith.constant 0 : i32
    %c0_i32_1 = arith.constant 0 : i32
    return %c0_i32, %c0_i32_0 : i32, i32
  }
  func.func @transform_5(%arg0: i32, %arg1: i32) -> (i32, i32) {
    %c0_i32 = arith.constant 0 : i32
    %c0_i32_0 = arith.constant 0 : i32
    %c0_i32_1 = arith.constant 0 : i32
    return %c0_i32, %c0_i32_0 : i32, i32
  }
  func.func @transform_6(%arg0: i32, %arg1: i32) -> (i32, i32) {
    %c0_i32 = arith.constant 0 : i32
    %c0_i32_0 = arith.constant 0 : i32
    return %arg0, %c0_i32 : i32, i32
  }
  func.func @transform_7(%arg0: i32, %arg1: i32) -> (i32, i32) {
    %c0_i32 = arith.constant 0 : i32
    %c0_i32_0 = arith.constant 0 : i32
    return %arg0, %c0_i32 : i32, i32
  }
}

</mosaic_0001>

<bundles_post_ra>
// kernel: model_forward.14
= control target key start
LH: loop header
LB: loop body
LE: loop exit
PB: predicated region body
PF: predicated region fallthrough
CT: control target
= control target key end

     0   :  { %vm19_vm0 = vcmask 785408   ;;  %v118_v0 = vmov 0.0   ;;  %vm119_vm1 = vmmov 0   ;;  %vm33_vm2 = vcmask 261120   ;;  %s173_s1 = inlined_call_operand.vmem [shape: f32[32,96], index: 1, kind: input, shape index: {}]   ;;  %s174_s0 = inlined_call_operand.vmem [shape: f32[16,32], index: 0, kind: input, shape index: {}]   ;;  %s175_s2 = inlined_call_operand.vmem [shape: f32[1,96], index: 2, kind: input, shape index: {}]   ;;  %s176_s3 = inlined_call_operand.vmem [shape: f32[16,96], index: 3, kind: output, shape index: {}]  }
   0x1   :  { %108 = vmatprep.subr.bf16.mxu0 %v118_v0  ;;  %v27_v1 = vld [vmem:[%s173_s1] sm:$0xff]  ;;  %v28_v2 = vld [vmem:[%s173_s1 + $0x8] sm:$0xff]  ;;  %v29_v3 = vld [vmem:[%s173_s1 + $0x10] sm:$0xff]  ;;  %112 = vmatprep.mubr.msk.bf16.mxu0 %vm119_vm1, %v118_v0  ;;  %20 = vst.msk [vmem:[#allocation2] sm:$0xff] %vm19_vm0, %v118_v0 }
   0x2   :  { %21 = vst.msk [vmem:[#allocation2 + $0x8] sm:$0xff] %vm19_vm0, %v118_v0  ;;  %v31_v4 = vpack.c.bf16 %v28_v2, %v27_v1  ;;  %v30_v5 = vld [vmem:[%s173_s1 + $0x18] sm:$0xff]  ;;  %v24_v7 = vld [vmem:[%s174_s0] sm:$0xff]  ;;  %v25_v8 = vld [vmem:[%s174_s0 + $0x8] sm:$0xff] }
   0x3   :  { %v32_v6 = vpack.c.bf16 %v30_v5, %v29_v3  ;;  %v26_v9 = vpack.c.bf16 %v25_v8, %v24_v7  ;;  %v104_v18 = vld [vmem:[%s175_s2] ss:$0 sm:$0xff] }
   0x4   :  { %109 = vmatpush3.bf16.msra.mxu0 %v31_v4 }
   0x5   :  { %110 = vmatprep.subr.bf16.mxu0 %v118_v0 }
   0x8   :  { %111 = vmatpush3.bf16.msra.mxu0 %v32_v6  ;;  %v22_v10 = vld [vmem:[#allocation2] sm:$0xff] }
   0x9   :  { %v23_v12 = vld [vmem:[#allocation2 + $0x8] sm:$0xff] }
   0xb   :  { %113 = vmatmul.mubr.msk.bf16.vlgmr.msra.gmra.mrb[0].mxu0 %vm33_vm2, %v26_v9 }
  0xde   :  { %v71_v11 = vpop.f32.mrb[0].mxu0 }
  0xdf   :  { %v78_v13 = vadd.f32 %v71_v11, %v22_v10  ;;  %v114_v14 = vpop.f32.mrb[1].mxu0 }
  0xe0   :  { %v74_v15 = vpop.f32.mrb[2].mxu0 }
  0xe1   :  { %81 = vst.msk [vmem:[#allocation2] sm:$0xff] %vm19_vm0, %v78_v13  ;;  %v79_v16 = vadd.f32 %v74_v15, %v23_v12  ;;  %v115_v17 = vpop.f32.mrb[3].mxu0 }
  0xe3   :  { %82 = vst.msk [vmem:[#allocation2 + $0x8] sm:$0xff] %vm19_vm0, %v79_v16 }
  0xe8   :  { %v86_v19 = vld [vmem:[#allocation2] sm:$0xff] }
  0xe9   :  { %v95_v20 = vadd.f32 %v104_v18, %v86_v19 }
  0xea   :  { %v87_v21 = vld [vmem:[#allocation2 + $0x8] sm:$0xff] }
  0xeb   :  { %97 = vst.msk [vmem:[%s176_s3] sm:$0xff] %vm19_vm0, %v95_v20  ;;  %v96_v22 = vadd.f32 %v104_v18, %v87_v21 }
  0xed   :  { %98 = vst.msk [vmem:[%s176_s3 + $0x8] sm:$0xff] %vm19_vm0, %v96_v22 }

// kernel: model_forward.16
= control target key start
LH: loop header
LB: loop body
LE: loop exit
PB: predicated region body
PF: predicated region fallthrough
CT: control target
= control target key end

     0   :  { %vm28_vm0 = vcmask 261120   ;;  %v181_v0 = vmov 0.0   ;;  %vm182_vm1 = vmmov 0   ;;  %s268_s1 = inlined_call_operand.vmem [shape: f32[32,32], index: 1, kind: input, shape index: {}]   ;;  %s269_s0 = inlined_call_operand.vmem [shape: f32[16,32], index: 0, kind: input, shape index: {}]   ;;  %s270_s2 = inlined_call_operand.vmem [shape: f32[1,32], index: 2, kind: input, shape index: {}]   ;;  %s271_s3 = inlined_call_operand.vmem [shape: f32[16,32], index: 3, kind: input, shape index: {}]   ;;  %s272_s4 = inlined_call_operand.vmem [shape: f32[1,32], index: 4, kind: input, shape index: {}]   ;;  %s273_s5 = inlined_call_operand.vmem [shape: f32[1,32], index: 5, kind: input, shape index: {}]   ;;  %s274_s6 = inlined_call_operand.vmem [shape: f32[16,32], index: 6, kind: output, shape index: {}]  }
   0x1   :  { %167 = vmatprep.subr.bf16.mxu0 %v181_v0  ;;  %v36_v1 = vld [vmem:[%s268_s1] sm:$0xff]  ;;  %v37_v2 = vld [vmem:[%s268_s1 + $0x8] sm:$0xff]  ;;  %v38_v3 = vld [vmem:[%s268_s1 + $0x10] sm:$0xff]  ;;  %171 = vmatprep.mubr.msk.bf16.mxu0 %vm182_vm1, %v181_v0  ;;  %29 = vst.msk [vmem:[#allocation2] sm:$0xff] %vm28_vm0, %v181_v0 }
   0x2   :  { %30 = vst.msk [vmem:[#allocation2 + $0x8] sm:$0xff] %vm28_vm0, %v181_v0  ;;  %v40_v4 = vpack.c.bf16 %v37_v2, %v36_v1  ;;  %v39_v5 = vld [vmem:[%s268_s1 + $0x18] sm:$0xff]  ;;  %v33_v7 = vld [vmem:[%s269_s0] sm:$0xff]  ;;  %v34_v8 = vld [vmem:[%s269_s0 + $0x8] sm:$0xff] }
   0x3   :  { %v41_v6 = vpack.c.bf16 %v39_v5, %v38_v3  ;;  %v35_v9 = vpack.c.bf16 %v34_v8, %v33_v7  ;;  %v161_v18 = vld [vmem:[%s270_s2] ss:$0 sm:$0xff]  ;;  %v106_v23 = vld [vmem:[%s271_s3 + $0x8] sm:$0xff] }
   0x4   :  { %168 = vmatpush3.bf16.msra.mxu0 %v40_v4  ;;  %v105_v20 = vld [vmem:[%s271_s3] sm:$0xff] }
   0x5   :  { %169 = vmatprep.subr.bf16.mxu0 %v181_v0  ;;  %v162_v46 = vld [vmem:[%s272_s4] ss:$0 sm:$0xff] }
   0x6   :  { %v163_v48 = vld [vmem:[%s273_s5] ss:$0 sm:$0xff] }
   0x8   :  { %170 = vmatpush3.bf16.msra.mxu0 %v41_v6  ;;  %v31_v10 = vld [vmem:[#allocation2] sm:$0xff] }
   0x9   :  { %v32_v12 = vld [vmem:[#allocation2 + $0x8] sm:$0xff] }
   0xb   :  { %172 = vmatmul.mubr.msk.bf16.vlgmr.msra.gmra.mrb[0].mxu0 %vm28_vm0, %v35_v9 }
  0xde   :  { %v80_v11 = vpop.f32.mrb[0].mxu0 }
  0xdf   :  { %v87_v13 = vadd.f32 %v80_v11, %v31_v10  ;;  %v173_v14 = vpop.f32.mrb[1].mxu0 }
  0xe0   :  { %v83_v15 = vpop.f32.mrb[2].mxu0 }
  0xe1   :  { %89 = vst.msk [vmem:[#allocation2] sm:$0xff] %vm28_vm0, %v87_v13  ;;  %v88_v16 = vadd.f32 %v83_v15, %v32_v12  ;;  %v174_v17 = vpop.f32.mrb[3].mxu0 }
  0xe3   :  { %90 = vst.msk [vmem:[#allocation2 + $0x8] sm:$0xff] %vm28_vm0, %v88_v16 }
  0xe8   :  { %v94_v19 = vld [vmem:[#allocation2] sm:$0xff] }
  0xe9   :  { %v103_v21 = vadd.f32 %v161_v18, %v94_v19 }
  0xea   :  { %v95_v22 = vld [vmem:[#allocation2 + $0x8] sm:$0xff] }
  0xeb   :  { %v107_v24 = vadd.f32 %v105_v20, %v103_v21  ;;  %v104_v25 = vadd.f32 %v161_v18, %v95_v22 }
  0xed   :  { %v109_v26 = vsel %vm28_vm0, %v107_v24, 0.0  ;;  %v108_v27 = vadd.f32 %v106_v23, %v104_v25 }
  0xee   :  { %110 = vadd.xlane.f32.xlu0 %v109_v26 }
  0xef   :  { %v112_v28 = vsel %vm28_vm0, %v108_v27, 0.0 }
  0xf2   :  { %113 = vadd.xlane.f32.xlu0 %v112_v28 }
 0x17b   :  { %v111_v29 = vpop.xlane.xlu0 %110 }
 0x17c   :  { %v116_v30 = vmul.f32 0.03125, %v111_v29 }
 0x17e   :  { %v118_v31 = vsub.f32 %v107_v24, %v116_v30 }
 0x17f   :  { %v114_v32 = vpop.xlane.xlu0 %113 }
 0x180   :  { %v117_v33 = vmul.f32 0.03125, %v114_v32  ;;  %v120_v34 = vmul.f32 %v118_v31, %v118_v31 }
 0x182   :  { %v119_v35 = vsub.f32 %v108_v27, %v117_v33  ;;  %v122_v36 = vsel %vm28_vm0, %v120_v34, 0.0 }
 0x183   :  { %123 = vadd.xlane.f32.xlu1 %v122_v36 }
 0x184   :  { %v121_v37 = vmul.f32 %v119_v35, %v119_v35 }
 0x186   :  { %v125_v38 = vsel %vm28_vm0, %v121_v37, 0.0 }
 0x187   :  { %126 = vadd.xlane.f32.xlu1 %v125_v38 }
 0x210   :  { %v124_v39 = vpop.xlane.xlu1 %123 }
 0x211   :  { %v128_v40 = vmul.f32 0.03125, %v124_v39 }
 0x213   :  { %v130_v41 = vadd.f32 1e-05, %v128_v40 }
 0x214   :  { %v127_v42 = vpop.xlane.xlu1 %126 }
 0x215   :  { %177 = vrsqrt.f32 %v130_v41  ;;  %v129_v43 = vmul.f32 0.03125, %v127_v42 }
 0x217   :  { %v131_v44 = vadd.f32 1e-05, %v129_v43 }
 0x219   :  { %179 = vrsqrt.f32 %v131_v44 }
 0x21f   :  { %v178_v45 = vpop.eup %177 }
 0x220   :  { %v134_v47 = vmul.f32 %v178_v45, %v118_v31 }
 0x222   :  { %v143_v49 = vmul.f32 %v162_v46, %v134_v47 }
 0x223   :  { %v180_v50 = vpop.eup %179 }
 0x224   :  { %v152_v51 = vadd.f32 %v163_v48, %v143_v49  ;;  %v135_v52 = vmul.f32 %v180_v50, %v119_v35 }
 0x226   :  { %154 = vst.msk [vmem:[%s274_s6] sm:$0xff] %vm28_vm0, %v152_v51  ;;  %v144_v53 = vmul.f32 %v162_v46, %v135_v52 }
 0x228   :  { %v153_v54 = vadd.f32 %v163_v48, %v144_v53 }
 0x22a   :  { %155 = vst.msk [vmem:[%s274_s6 + $0x8] sm:$0xff] %vm28_vm0, %v153_v54 }

// kernel: model_forward.13
= control target key start
LH: loop header
LB: loop body
LE: loop exit
PB: predicated region body
PF: predicated region fallthrough
CT: control target
= control target key end

     0   :  { %vm16_vm0 = vcmask 261120   ;;  %s118_s0 = inlined_call_operand.vmem [shape: f32[16,32], index: 0, kind: input, shape index: {}]   ;;  %s119_s1 = inlined_call_operand.vmem [shape: f32[1,32], index: 1, kind: input, shape index: {}]   ;;  %s120_s2 = inlined_call_operand.vmem [shape: f32[1,32], index: 2, kind: input, shape index: {}]   ;;  %s121_s3 = inlined_call_operand.vmem [shape: f32[16,32], index: 3, kind: output, shape index: {}]  }
   0x1   :  { %v14_v0 = vld [vmem:[%s118_s0] sm:$0xff]  ;;  %v15_v1 = vld [vmem:[%s118_s0 + $0x8] sm:$0xff] }
   0x2   :  { %v17_v2 = vsel %vm16_vm0, %v14_v0, 0.0  ;;  %v20_v3 = vsel %vm16_vm0, %v15_v1, 0.0  ;;  %v68_v21 = vld [vmem:[%s119_s1] ss:$0 sm:$0xff] }
   0x3   :  { %18 = vadd.xlane.f32.xlu0 %v17_v2  ;;  %v69_v23 = vld [vmem:[%s120_s2] ss:$0 sm:$0xff] }
   0x7   :  { %21 = vadd.xlane.f32.xlu0 %v20_v3 }
  0x90   :  { %v19_v4 = vpop.xlane.xlu0 %18 }
  0x91   :  { %v24_v5 = vmul.f32 0.03125, %v19_v4 }
  0x93   :  { %v26_v6 = vsub.f32 %v14_v0, %v24_v5 }
  0x94   :  { %v22_v7 = vpop.xlane.xlu0 %21 }
  0x95   :  { %v25_v8 = vmul.f32 0.03125, %v22_v7  ;;  %v28_v9 = vmul.f32 %v26_v6, %v26_v6 }
  0x97   :  { %v27_v10 = vsub.f32 %v15_v1, %v25_v8  ;;  %v30_v11 = vsel %vm16_vm0, %v28_v9, 0.0 }
  0x98   :  { %31 = vadd.xlane.f32.xlu1 %v30_v11 }
  0x99   :  { %v29_v12 = vmul.f32 %v27_v10, %v27_v10 }
  0x9b   :  { %v33_v13 = vsel %vm16_vm0, %v29_v12, 0.0 }
  0x9c   :  { %34 = vadd.xlane.f32.xlu1 %v33_v13 }
 0x125   :  { %v32_v14 = vpop.xlane.xlu1 %31 }
 0x126   :  { %v36_v15 = vmul.f32 0.03125, %v32_v14 }
 0x128   :  { %v38_v16 = vadd.f32 1e-05, %v36_v15 }
 0x129   :  { %v35_v17 = vpop.xlane.xlu1 %34 }
 0x12a   :  { %70 = vrsqrt.f32 %v38_v16  ;;  %v37_v18 = vmul.f32 0.03125, %v35_v17 }
 0x12c   :  { %v39_v19 = vadd.f32 1e-05, %v37_v18 }
 0x12e   :  { %72 = vrsqrt.f32 %v39_v19 }
 0x134   :  { %v71_v20 = vpop.eup %70 }
 0x135   :  { %v42_v22 = vmul.f32 %v71_v20, %v26_v6 }
 0x137   :  { %v51_v24 = vmul.f32 %v68_v21, %v42_v22 }
 0x138   :  { %v73_v25 = vpop.eup %72 }
 0x139   :  { %v60_v26 = vadd.f32 %v69_v23, %v51_v24  ;;  %v43_v27 = vmul.f32 %v73_v25, %v27_v10 }
 0x13b   :  { %62 = vst.msk [vmem:[%s121_s3] sm:$0xff] %vm16_vm0, %v60_v26  ;;  %v52_v28 = vmul.f32 %v68_v21, %v43_v27 }
 0x13d   :  { %v61_v29 = vadd.f32 %v69_v23, %v52_v28 }
 0x13f   :  { %63 = vst.msk [vmem:[%s121_s3 + $0x8] sm:$0xff] %vm16_vm0, %v61_v29 }

// kernel: model_forward.15
= control target key start
LH: loop header
LB: loop body
LE: loop exit
PB: predicated region body
PF: predicated region fallthrough
CT: control target
= control target key end

     0   :  { %s849_s9 = smov 0   ;;  %s945_s0 = inlined_call_operand.vmem [shape: f32[2,8,96], index: 0, kind: input, shape index: {}]   ;;  %s946_s1 = inlined_call_operand.vmem [shape: f32[2,1,8], index: 1, kind: input, shape index: {}]   ;;  %s947_s2 = inlined_call_operand.vmem [shape: f32[2,8,32], index: 2, kind: output, shape index: {}]  }
   0x1 LB: > { %s688_s10 = sadd.s32 4294967295, %s816_s9   ;;  %p692_p0 = scmp.ge.s32.totalorder %s816_s9, 1  ;;  %s816_s9 = sphi %s849_s9, %s12_s9  }
   0x2   : > { %p119_p1 = scmp.lt.s32.totalorder %s816_s9, 3 }
   0x4   : > { %p120_p2 = pnand %p692_p0, %p119_p1 }
   0x5   : > { %p142_p3 = scmp.lt.s32.totalorder (!%p120_p2), %s688_s10, 1  ;;  %v818_v0 = vmov (!%p120_p2), 0.0   ;;  %vm819_vm0 = vmmov (!%p120_p2), 0   ;;  %s820_s15 = smov (!%p120_p2), 96   ;;  %vm168_vm1 = vcmask (!%p120_p2), 64512   ;;  %vm232_vm2 = vcmask (!%p120_p2), 1043456  }
   0x6   : > { %123 = sbr.rel (%p120_p2) target bundleno = 1600 (0x640), region = 28  ;;  %722 = vmatprep.subr.bf16.mxu0 (!%p120_p2), %v818_v0  ;;  %724 = vmatprep.mubr.msk.bf16.mxu0 (!%p120_p2), %vm819_vm0, %v818_v0  ;;  %s821_s16 = smov (!%p120_p2), 64   ;;  %vm620_vm3 = vcmask (!%p120_p2), 130048   ;;  %vm622_vm4 = vcmask (!%p120_p2), 195584   ;;  %vm624_vm5 = vcmask (!%p120_p2), 261120  }
   0x7   : > { %728 = vmatprep.subr.bf16.mxu1 (!%p120_p2), %v818_v0  ;;  %730 = vmatprep.mubr.msk.bf16.mxu1 (!%p120_p2), %vm819_vm0, %v818_v0  ;;  %s822_s17 = smov (!%p120_p2), 88   ;;  %s823_s21 = smov (!%p120_p2), 72  }
   0x8   : > { %s824_s22 = smov (!%p120_p2), 120   ;;  %s825_s23 = smov (!%p120_p2), 80  }
   0x9   : > { %s826_s24 = smov (!%p120_p2), 112   ;;  %s827_s25 = smov (!%p120_p2), 104  }
   0xa   : > { %s828_s26 = smov (!%p120_p2), 56   ;;  %s829_s27 = smov (!%p120_p2), 48  }
   0xb   : > { %s830_s28 = smov (!%p120_p2), 40   ;;  %s831_s29 = smov (!%p120_p2), 8  }
   0xc   : > { %s832_s30 = smov (!%p120_p2), 16   ;;  %s833_s3 = smov (!%p120_p2), 24  }
   0xd   : > { %s949_s10 = smov (!%p142_p3, %s688_s10), 1 }
   0xe   : > { %s693_s11 = sshll.u32 %s949_s10, 3  ;;  %s148_s20 = scalar_lea.vmem %s946_s1, %s949_s10 }
   0xf   : > { %s145_s14 = scalar_lea.vmem %s945_s0, %s693_s11  ;;  %v885_v7 = vld [vmem:[%s148_s20] ss:$0 sm:$0xff]  ;;  %s152_s6 = scalar_lea.vmem %s947_s2, %s693_s11 }
  0x10   : > { %v154_v1 = vld [vmem:[%s145_s14] sm:$0xff] }
  0x11   : > { %v871_v2 = vpack.c.bf16 %v154_v1, %v154_v1  ;;  %v156_v5 = vmul.f32 0.35355338, %v154_v1 }
  0x13   : > { %166 = vrot.lane.b32.xlu0 %v871_v2, %s820_s15  ;;  %v157_v6 = vpack.c.bf16 %v156_v5, %v156_v5  ;;  %227 = vrot.lane.b32.xlu1 %v871_v2, %s821_s16 }
  0x17   : > { %279 = vrot.lane.b32.xlu1 %v871_v2, %s822_s17 }
  0x85   : > { %v167_v3 = vpop.permute.xlu0 %166  ;;  %v228_v14 = vpop.permute.xlu1 %227 }
  0x86   : > { %v173_v4 = vsel %vm168_vm1, %v167_v3, 0  ;;  %v234_v15 = vsel %vm232_vm2, %v228_v14, 0 }
  0x87   : > { %723 = vmatpush3.bf16.xpose.msra.mxu0 %v173_v4  ;;  %729 = vmatpush3.bf16.msra.mxu1 %v234_v15 }
  0x88   : > { %740 = vmatprep.subr.bf16.mxu0 %v818_v0  ;;  %734 = vmatprep.subr.bf16.mxu1 %v818_v0 }
  0x89   : > { %v280_v21 = vpop.permute.xlu1 %279 }
  0x8a   : > { %v285_v27 = vsel %vm168_vm1, %v280_v21, 0 }
  0x8e   : > { %725 = vmatmul.mubr.msk.bf16.vlgmr.msra.gmra.mrb[0].mxu0 %vm168_vm1, %v157_v6 }
  0x8f   : > { %742 = vmatprep.mubr.msk.bf16.mxu0 %vm819_vm0, %v818_v0 }
 0x161   : > { %v209_v8 = vpop.f32.mrb[0].mxu0 }
 0x162   : > { %v210_v9 = vadd.f32 %v885_v7, %v209_v8  ;;  %v726_v10 = vpop.f32.mrb[1].mxu0 }
 0x163   : > { %v212_v11 = vpop.f32.mrb[2].mxu0 }
 0x164   : > { %v727_v12 = vpop.f32.mrb[3].mxu0  ;;  %v215_v13 = vsel %vm168_vm1, %v210_v9, -inf }
 0x165   : > { %216 = vmax.xlane.f32.xlu0 %v215_v13 }
 0x17b   : > { %499 = vrot.lane.b32.xlu0 %v871_v2, %s823_s21 }
 0x1f2   : > { %v217_v16 = vpop.xlane.xlu0 %216 }
 0x1f3   : > { %v218_v17 = vsub.f32 %v210_v9, %v217_v16 }
 0x1f5   : > { %v219_v18 = vmul.f32 1.442695, %v218_v17 }
 0x1f6   : > { %v500_v30 = vpop.permute.xlu0 %499 }
 0x1f7   : > { %794 = vpow2.f32 %v219_v18  ;;  %v505_v32 = vsel %vm168_vm1, %v500_v30, 0 }
 0x201   : > { %v795_v19 = vpop.eup %794 }
 0x202   : > { %v221_v20 = vsel %vm168_vm1, %v795_v19, 0.0 }
 0x203   : > { %222 = vadd.xlane.f32.xlu1 %v221_v20 }
 0x214   : > { %277 = vrot.lane.b32.xlu1 %v157_v6, %s824_s22 }
 0x218   : > { %389 = vrot.lane.b32.xlu1 %v871_v2, %s825_s23 }
 0x21c   : > { %387 = vrot.lane.b32.xlu1 %v157_v6, %s826_s24 }
 0x220   : > { %497 = vrot.lane.b32.xlu1 %v157_v6, %s827_s25 }
 0x290   : > { %v223_v22 = vpop.xlane.xlu1 %222 }
 0x291   : > { %796 = vrcp.f32 %v223_v22 }
 0x294   : > { %v278_v25 = vpop.permute.xlu1 %277 }
 0x298   : > { %v390_v28 = vpop.permute.xlu1 %389 }
 0x299   : > { %v395_v29 = vsel %vm168_vm1, %v390_v28, 0 }
 0x29b   : > { %v797_v23 = vpop.eup %796 }
 0x29c   : > { %v225_v24 = vmul.f32 %v797_v23, %v795_v19  ;;  %v388_v31 = vpop.permute.xlu1 %387 }
 0x29e   : > { %v226_v26 = vpack.c.bf16 %v225_v24, %v225_v24 }
 0x2a0   : > { %731 = vmatmul.mubr.msk.bf16.vlgmr.msra.gmra.mrb[0].mxu1 %vm168_vm1, %v226_v26  ;;  %v498_v33 = vpop.permute.xlu1 %497 }
 0x2a1   : > { %735 = vmatpush3.bf16.xpose.msra.mxu1 %v285_v27  ;;  %736 = vmatprep.mubr.msk.bf16.mxu1 %vm819_vm0, %v818_v0 }
 0x2a2   : > { %746 = vmatprep.subr.bf16.mxu1 %v818_v0 }
 0x2a8   : > { %737 = vmatmul.mubr.msk.bf16.vlgmr.msra.gmra.mrb[4].mxu1 %vm168_vm1, %v278_v25 }
 0x2a9   : > { %747 = vmatpush3.bf16.xpose.msra.mxu1 %v395_v29  ;;  %748 = vmatprep.mubr.msk.bf16.mxu1 %vm819_vm0, %v818_v0 }
 0x2aa   : > { %758 = vmatprep.subr.bf16.mxu1 %v818_v0 }
 0x2b0   : > { %749 = vmatmul.mubr.msk.bf16.vlgmr.msra.gmra.mrb[8].mxu1 %vm168_vm1, %v388_v31 }
 0x2b1   : > { %759 = vmatpush3.bf16.xpose.msra.mxu1 %v505_v32  ;;  %760 = vmatprep.mubr.msk.bf16.mxu1 %vm819_vm0, %v818_v0 }
 0x2b8   : > { %761 = vmatmul.mubr.msk.bf16.vlgmr.msra.gmra.mrb[12].mxu1 %vm168_vm1, %v498_v33 }
 0x373   : > { %v909_v34 = vpop.f32.mrb[0].mxu1 }
 0x374   : > { %v732_v35 = vpop.f32.mrb[1].mxu1 }
 0x375   : > { %v273_v36 = vpop.f32.mrb[2].mxu1 }
 0x376   : > { %v733_v37 = vpop.f32.mrb[3].mxu1 }
 0x37b   : > { %v321_v38 = vpop.f32.mrb[4].mxu1 }
 0x37c   : > { %v322_v39 = vadd.f32 %v885_v7, %v321_v38  ;;  %v738_v40 = vpop.f32.mrb[5].mxu1 }
 0x37d   : > { %v324_v41 = vpop.f32.mrb[6].mxu1 }
 0x37e   : > { %v739_v42 = vpop.f32.mrb[7].mxu1  ;;  %v327_v43 = vsel %vm168_vm1, %v322_v39, -inf }
 0x37f   : > { %328 = vmax.xlane.f32.xlu1 %v327_v43 }
 0x383   : > { %v431_v44 = vpop.f32.mrb[8].mxu1 }
 0x384   : > { %v432_v45 = vadd.f32 %v885_v7, %v431_v44  ;;  %v750_v46 = vpop.f32.mrb[9].mxu1 }
 0x385   : > { %v434_v47 = vpop.f32.mrb[10].mxu1 }
 0x386   : > { %v437_v48 = vsel %vm168_vm1, %v432_v45, -inf  ;;  %v751_v49 = vpop.f32.mrb[11].mxu1 }
 0x387   : > { %438 = vmax.xlane.f32.xlu0 %v437_v48 }
 0x38b   : > { %v541_v50 = vpop.f32.mrb[12].mxu1 }
 0x38c   : > { %v542_v51 = vadd.f32 %v885_v7, %v541_v50  ;;  %v762_v52 = vpop.f32.mrb[13].mxu1 }
 0x38d   : > { %v544_v53 = vpop.f32.mrb[14].mxu1 }
 0x38e   : > { %v547_v54 = vsel %vm168_vm1, %v542_v51, -inf  ;;  %v763_v55 = vpop.f32.mrb[15].mxu1 }
 0x38f   : > { %548 = vmax.xlane.f32.xlu1 %v547_v54 }
 0x40c   : > { %v329_v56 = vpop.xlane.xlu1 %328 }
 0x40d   : > { %v330_v57 = vsub.f32 %v322_v39, %v329_v56 }
 0x40f   : > { %v331_v58 = vmul.f32 1.442695, %v330_v57 }
 0x411   : > { %798 = vpow2.f32 %v331_v58 }
 0x414   : > { %v439_v4 = vpop.xlane.xlu0 %438 }
 0x415   : > { %v440_v5 = vsub.f32 %v432_v45, %v439_v4 }
 0x417   : > { %v441_v6 = vmul.f32 1.442695, %v440_v5 }
 0x41b   : > { %v799_v59 = vpop.eup %798 }
 0x41c   : > { %v549_v60 = vpop.xlane.xlu1 %548  ;;  %v333_v61 = vsel %vm168_vm1, %v799_v59, 0.0 }
 0x41d   : > { %v550_v62 = vsub.f32 %v542_v51, %v549_v60  ;;  %334 = vadd.xlane.f32.xlu1 %v333_v61 }
 0x41f   : > { %v551_v63 = vmul.f32 1.442695, %v550_v62 }
 0x421   : > { %800 = vpow2.f32 %v551_v63 }
 0x422   : > { %802 = vpow2.f32 %v441_v6 }
 0x42b   : > { %v801_v1 = vpop.eup %800 }
 0x42c   : > { %v553_v3 = vsel %vm168_vm1, %v801_v1, 0.0  ;;  %v803_v7 = vpop.eup %802 }
 0x42d   : > { %554 = vadd.xlane.f32.xlu0 %v553_v3  ;;  %v443_v8 = vsel %vm168_vm1, %v803_v7, 0.0 }
 0x42e   : > { %339 = vrot.lane.b32.xlu1 %v871_v2, %s828_s26 }
 0x443   : > { %449 = vrot.lane.b32.xlu0 %v871_v2, %s829_s27 }
 0x452   : > { %444 = vadd.xlane.f32.xlu1 %v443_v8 }
 0x463   : > { %559 = vrot.lane.b32.xlu1 %v871_v2, %s830_s28 }
 0x4aa   : > { %v335_v9 = vpop.xlane.xlu1 %334 }
 0x4ab   : > { %804 = vrcp.f32 %v335_v9 }
 0x4ae   : > { %v340_v10 = vpop.permute.xlu1 %339 }
 0x4af   : > { %v345_v11 = vsel %vm232_vm2, %v340_v10, 0 }
 0x4b0   : > { %741 = vmatpush3.bf16.msra.mxu0 %v345_v11 }
 0x4b1   : > { %752 = vmatprep.subr.bf16.mxu0 %v818_v0 }
 0x4b5   : > { %v805_v12 = vpop.eup %804 }
 0x4b6   : > { %v337_v13 = vmul.f32 %v805_v12, %v799_v59 }
 0x4b8   : > { %v338_v14 = vpack.c.bf16 %v337_v13, %v337_v13 }
 0x4ba   : > { %743 = vmatmul.mubr.msk.bf16.vlgmr.msra.gmra.mrb[4].mxu0 %vm168_vm1, %v338_v14  ;;  %v555_v15 = vpop.xlane.xlu0 %554 }
 0x4bb   : > { %754 = vmatprep.mubr.msk.bf16.mxu0 %vm819_vm0, %v818_v0 }
 0x4be   : > { %v450_v16 = vpop.permute.xlu0 %449 }
 0x4bf   : > { %v455_v2 = vsel %vm232_vm2, %v450_v16, 0 }
 0x4c0   : > { %753 = vmatpush3.bf16.msra.mxu0 %v455_v2 }
 0x4c1   : > { %764 = vmatprep.subr.bf16.mxu0 %v818_v0 }
 0x4df   : > { %v445_v17 = vpop.xlane.xlu1 %444 }
 0x4e0   : > { %806 = vrcp.f32 %v445_v17 }
 0x4e1   : > { %808 = vrcp.f32 %v555_v15 }
 0x4e3   : > { %v560_v19 = vpop.permute.xlu1 %559 }
 0x4e4   : > { %v565_v21 = vsel %vm232_vm2, %v560_v19, 0 }
 0x4ea   : > { %v807_v18 = vpop.eup %806 }
 0x4eb   : > { %v447_v20 = vmul.f32 %v807_v18, %v803_v7  ;;  %v809_v23 = vpop.eup %808 }
 0x4ec   : > { %v557_v24 = vmul.f32 %v809_v23, %v801_v1 }
 0x4ed   : > { %v448_v22 = vpack.c.bf16 %v447_v20, %v447_v20 }
 0x4ee   : > { %v558_v25 = vpack.c.bf16 %v557_v24, %v557_v24 }
 0x4ef   : > { %755 = vmatmul.mubr.msk.bf16.vlgmr.msra.gmra.mrb[8].mxu0 %vm168_vm1, %v448_v22 }
 0x4f0   : > { %765 = vmatpush3.bf16.msra.mxu0 %v565_v21  ;;  %766 = vmatprep.mubr.msk.bf16.mxu0 %vm819_vm0, %v818_v0 }
 0x4f7   : > { %767 = vmatmul.mubr.msk.bf16.vlgmr.msra.gmra.mrb[12].mxu0 %vm168_vm1, %v558_v25 }
 0x58d   : > { %v381_v26 = vpop.f32.mrb[4].mxu0 }
 0x58e   : > { %608 = vrot.lane.b32.xlu1 %v381_v26, %s831_s29  ;;  %v744_v27 = vpop.f32.mrb[5].mxu0 }
 0x58f   : > { %v384_v28 = vpop.f32.mrb[6].mxu0 }
 0x590   : > { %v745_v29 = vpop.f32.mrb[7].mxu0 }
 0x5c2   : > { %v491_v30 = vpop.f32.mrb[8].mxu0 }
 0x5c3   : > { %612 = vrot.lane.b32.xlu0 %v491_v30, %s832_s30  ;;  %v756_v31 = vpop.f32.mrb[9].mxu0 }
 0x5c4   : > { %v494_v32 = vpop.f32.mrb[10].mxu0 }
 0x5c5   : > { %v757_v33 = vpop.f32.mrb[11].mxu0 }
 0x5ca   : > { %v601_v35 = vpop.f32.mrb[12].mxu0 }
 0x5cb   : > { %616 = vrot.lane.b32.xlu1 %v601_v35, %s833_s3  ;;  %v768_v0 = vpop.f32.mrb[13].mxu0 }
 0x5cc   : > { %v604_v36 = vpop.f32.mrb[14].mxu0 }
 0x5cd   : > { %v769_v37 = vpop.f32.mrb[15].mxu0 }
 0x600   : > { %v609_v38 = vpop.permute.xlu1 %608 }
 0x601   : > { %v619_v40 = vsel %vm168_vm1, %v909_v34, %v609_v38 }
 0x635   : > { %v613_v39 = vpop.permute.xlu0 %612 }
 0x636   : > { %v621_v41 = vsel %vm620_vm3, %v619_v40, %v613_v39 }
 0x63d   : > { %v617_v42 = vpop.permute.xlu1 %616 }
 0x63e   : > { %v623_v43 = vsel %vm622_vm4, %v621_v41, %v617_v42 }
 0x63f   : > { %625 = vst.msk [vmem:[%s152_s6] sm:$0xff] %vm624_vm5, %v623_v43 }
 0x640 PF: > { %s12_s9 = sadd.s32 1, %s816_s9  }
 0x641   : > { %p9_p4 = scmp.ge.s32.totalorder %s12_s9, 4  }
 0x643   :  { %11 = sbr.rel (!%p9_p4) target bundleno = 1 (0x1), region = 61 }

// kernel: model_forward.17
= control target key start
LH: loop header
LB: loop body
LE: loop exit
PB: predicated region body
PF: predicated region fallthrough
CT: control target
= control target key end

     0   :  { %vm19_vm0 = vcmask 523264   ;;  %v132_v0 = vmov 0.0   ;;  %vm133_vm1 = vmmov 0   ;;  %vm33_vm2 = vcmask 261120   ;;  %s187_s1 = inlined_call_operand.vmem [shape: f32[32,64], index: 1, kind: input, shape index: {}]   ;;  %s188_s0 = inlined_call_operand.vmem [shape: f32[16,32], index: 0, kind: input, shape index: {}]   ;;  %s189_s2 = inlined_call_operand.vmem [shape: f32[1,64], index: 2, kind: input, shape index: {}]   ;;  %s190_s3 = inlined_call_operand.vmem [shape: f32[16,64], index: 3, kind: output, shape index: {}]  }
   0x1   :  { %118 = vmatprep.subr.bf16.mxu0 %v132_v0  ;;  %v27_v1 = vld [vmem:[%s187_s1] sm:$0xff]  ;;  %v28_v2 = vld [vmem:[%s187_s1 + $0x8] sm:$0xff]  ;;  %v29_v3 = vld [vmem:[%s187_s1 + $0x10] sm:$0xff]  ;;  %122 = vmatprep.mubr.msk.bf16.mxu0 %vm133_vm1, %v132_v0  ;;  %20 = vst.msk [vmem:[#allocation2] sm:$0xff] %vm19_vm0, %v132_v0 }
   0x2   :  { %21 = vst.msk [vmem:[#allocation2 + $0x8] sm:$0xff] %vm19_vm0, %v132_v0  ;;  %v31_v4 = vpack.c.bf16 %v28_v2, %v27_v1  ;;  %v30_v5 = vld [vmem:[%s187_s1 + $0x18] sm:$0xff]  ;;  %v24_v7 = vld [vmem:[%s188_s0] sm:$0xff]  ;;  %v25_v8 = vld [vmem:[%s188_s0 + $0x8] sm:$0xff] }
   0x3   :  { %v32_v6 = vpack.c.bf16 %v30_v5, %v29_v3  ;;  %v26_v9 = vpack.c.bf16 %v25_v8, %v24_v7  ;;  %v114_v18 = vld [vmem:[%s189_s2] ss:$0 sm:$0xff] }
   0x4   :  { %119 = vmatpush3.bf16.msra.mxu0 %v31_v4 }
   0x5   :  { %120 = vmatprep.subr.bf16.mxu0 %v132_v0 }
   0x8   :  { %121 = vmatpush3.bf16.msra.mxu0 %v32_v6  ;;  %v22_v10 = vld [vmem:[#allocation2] sm:$0xff] }
   0x9   :  { %v23_v12 = vld [vmem:[#allocation2 + $0x8] sm:$0xff] }
   0xb   :  { %123 = vmatmul.mubr.msk.bf16.vlgmr.msra.gmra.mrb[0].mxu0 %vm33_vm2, %v26_v9 }
  0xde   :  { %v71_v11 = vpop.f32.mrb[0].mxu0 }
  0xdf   :  { %v78_v13 = vadd.f32 %v71_v11, %v22_v10  ;;  %v124_v14 = vpop.f32.mrb[1].mxu0 }
  0xe0   :  { %v74_v15 = vpop.f32.mrb[2].mxu0 }
  0xe1   :  { %81 = vst.msk [vmem:[#allocation2] sm:$0xff] %vm19_vm0, %v78_v13  ;;  %v79_v16 = vadd.f32 %v74_v15, %v23_v12  ;;  %v125_v17 = vpop.f32.mrb[3].mxu0 }
  0xe3   :  { %82 = vst.msk [vmem:[#allocation2 + $0x8] sm:$0xff] %vm19_vm0, %v79_v16 }
  0xe8   :  { %v86_v19 = vld [vmem:[#allocation2] sm:$0xff] }
  0xe9   :  { %v95_v20 = vadd.f32 %v114_v18, %v86_v19 }
  0xea   :  { %v87_v21 = vld [vmem:[#allocation2 + $0x8] sm:$0xff] }
  0xeb   :  { %v99_v22 = vmul.f32 0.70710677, %v95_v20  ;;  %v96_v23 = vadd.f32 %v114_v18, %v87_v21  ;;  %v97_v26 = vmul.f32 0.5, %v95_v20 }
  0xed   :  { %128 = verf.f32 %v99_v22  ;;  %v100_v24 = vmul.f32 0.70710677, %v96_v23  ;;  %v98_v30 = vmul.f32 0.5, %v96_v23 }
  0xef   :  { %130 = verf.f32 %v100_v24 }
  0xf7   :  { %v129_v25 = vpop.eup %128 }
  0xf8   :  { %v103_v27 = vadd.f32 1.0, %v129_v25 }
  0xf9   :  { %v131_v28 = vpop.eup %130 }
  0xfa   :  { %v105_v29 = vmul.f32 %v103_v27, %v97_v26  ;;  %v104_v31 = vadd.f32 1.0, %v131_v28 }
  0xfc   :  { %107 = vst.msk [vmem:[%s190_s3] sm:$0xff] %vm19_vm0, %v105_v29  ;;  %v106_v32 = vmul.f32 %v104_v31, %v98_v30 }
  0xfe   :  { %108 = vst.msk [vmem:[%s190_s3 + $0x8] sm:$0xff] %vm19_vm0, %v106_v32 }

// kernel: model_forward.25
= control target key start
LH: loop header
LB: loop body
LE: loop exit
PB: predicated region body
PF: predicated region fallthrough
CT: control target
= control target key end

     0   :  { %v158_v3 = vmov 0.0   ;;  %vm159_vm0 = vmmov 0   ;;  %vm20_vm1 = vcmask 523264   ;;  %s222_s0 = inlined_call_operand.vmem [shape: f32[16,32], index: 0, kind: input, shape index: {}]   ;;  %s223_s1 = inlined_call_operand.vmem [shape: f32[32,64], index: 1, kind: input, shape index: {}]   ;;  %s224_s2 = inlined_call_operand.vmem [shape: f32[1,64], index: 2, kind: input, shape index: {}]   ;;  %s225_s3 = inlined_call_operand.hbm [shape: f32[16,64], index: 3, kind: output, shape index: {}]  }
   0x1   :  { %v28_v0 = vld [vmem:[%s223_s1] sm:$0xff]  ;;  %v29_v1 = vld [vmem:[%s223_s1 + $0x8] sm:$0xff]  ;;  %v30_v2 = vld [vmem:[%s223_s1 + $0x10] sm:$0xff]  ;;  %121 = vmatprep.subr.bf16.mxu0 %v158_v3  ;;  %125 = vmatprep.mubr.msk.bf16.mxu0 %vm159_vm0, %v158_v3  ;;  %21 = vst.msk [vmem:[#allocation2] sm:$0xff] %vm20_vm1, %v158_v3 }
   0x2   :  { %v32_v4 = vpack.c.bf16 %v29_v1, %v28_v0  ;;  %v31_v5 = vld [vmem:[%s223_s1 + $0x18] sm:$0xff]  ;;  %22 = vst.msk [vmem:[#allocation2 + $0x8] sm:$0xff] %vm20_vm1, %v158_v3 }
   0x3   :  { %8 = vsyncpa [#allocation4], 0  ;;  %v33_v6 = vpack.c.bf16 %v31_v5, %v30_v2  ;;  %v25_v7 = vld [vmem:[%s222_s0] sm:$0xff]  ;;  %v26_v8 = vld [vmem:[%s222_s0 + $0x8] sm:$0xff]  ;;  %vm34_vm2 = vcmask 261120   ;;  %s160_s0 = smov [#allocation3]  }
   0x4   :  { %122 = vmatpush3.bf16.msra.mxu0 %v32_v4  ;;  %v27_v9 = vpack.c.bf16 %v26_v8, %v25_v7  ;;  %v117_v18 = vld [vmem:[%s224_s2] ss:$0 sm:$0xff]  ;;  %s105_s25 = sshll.u32 %s160_s0, 4  ;;  %s106_s25 = int_to_ptr.vmem [resolvable:$true] %s105_s25 }
   0x5   :  { %123 = vmatprep.subr.bf16.mxu0 %v158_v3  ;;  %s134_s26 = scalar_lea.vmem %s106_s25, 256  ;;  %p139_p1 = scmp.lt.s32.totalorder %s106_s25, %s106_s25 }
   0x6   :  { %p135_p0 = scmp.ne.s32.totalorder %s106_s25, %s134_s26  ;;  %p140_p2 = scmp.lt.s32.totalorder %s134_s26, %s134_s26 }
   0x8   :  { %124 = vmatpush3.bf16.msra.mxu0 %v33_v6  ;;  %v23_v10 = vld [vmem:[#allocation2] sm:$0xff]  ;;  %p141_p3 = por %p140_p2, %p139_p1 }
   0x9   :  { %v24_v12 = vld [vmem:[#allocation2 + $0x8] sm:$0xff] }
   0xa   :  { %p142_p4 = pnand %p141_p3, %p135_p0 }
   0xb   :  { %126 = vmatmul.mubr.msk.bf16.vlgmr.msra.gmra.mrb[0].mxu0 %vm34_vm2, %v27_v9 }
  0xde   :  { %v72_v11 = vpop.f32.mrb[0].mxu0 }
  0xdf   :  { %v79_v13 = vadd.f32 %v72_v11, %v23_v10  ;;  %v127_v14 = vpop.f32.mrb[1].mxu0 }
  0xe0   :  { %v75_v15 = vpop.f32.mrb[2].mxu0 }
  0xe1   :  { %82 = vst.msk [vmem:[#allocation2] sm:$0xff] %vm20_vm1, %v79_v13  ;;  %v80_v16 = vadd.f32 %v75_v15, %v24_v12  ;;  %v128_v17 = vpop.f32.mrb[3].mxu0 }
  0xe3   :  { %83 = vst.msk [vmem:[#allocation2 + $0x8] sm:$0xff] %vm20_vm1, %v80_v16 }
  0xe8   :  { %v87_v19 = vld [vmem:[#allocation2] sm:$0xff] }
  0xe9   :  { %v96_v20 = vadd.f32 %v117_v18, %v87_v19 }
  0xea   :  { %v88_v21 = vld [vmem:[#allocation2 + $0x8] sm:$0xff] }
  0xeb   :  { %v97_v22 = vadd.f32 %v117_v18, %v88_v21  ;;  %98 = vst.msk [vmem:[#allocation3] sm:$0xff] %vm20_vm1, %v96_v20 }
  0xed   :  { %99 = vst.msk [vmem:[#allocation3 + $0x8] sm:$0xff] %vm20_vm1, %v97_v22 }
  0xee   :  { %145 = shalt.err (!%p142_p4)
}
  0xef   :  { %s146_s28 = scalar_lea.hbm %s225_s3, 256 }
  0xf0   :  { %p147_p5 = scmp.ne.s32.totalorder %s225_s3, %s146_s28  ;;  %p150_p6 = scmp.lt.u32.totalorder %s146_s28, %s225_s3 }
  0xf2   :  { %p152_p7 = pnand %p150_p6, %p147_p5 }
  0xf4   :  { %155 = shalt.err (!%p152_p7)
}
  0xf5   :  { %s161_s6 = smov 128   ;;  %s162_s7 = smov 8  }
  0xf6   :  { %111 = dma.vmem_to_hbm [thread:$0]  %s106_s25, 256, %s225_s3, [#allocation4], %s161_s6, %s161_s6, %s162_s7  }
  0xf7   :  { %156 = dma.done.wait [#allocation4], 256  }
  0xf8   :  { %157 = vsyncadd [#allocation4], 4294967040 }
  0xf9   :  { %115 = vsyncpa [#allocation4], 1 }

// kernel: model_forward.24
= control target key start
LH: loop header
LB: loop body
LE: loop exit
PB: predicated region body
PF: predicated region fallthrough
CT: control target
= control target key end

     0   :  { %vm25_vm0 = vcmask 261120   ;;  %v188_v0 = vmov 0.0   ;;  %vm189_vm1 = vmmov 0   ;;  %s264_s1 = inlined_call_operand.vmem [shape: f32[32,32], index: 1, kind: input, shape index: {}]   ;;  %s265_s0 = inlined_call_operand.vmem [shape: f32[16,32], index: 0, kind: input, shape index: {}]   ;;  %s266_s2 = inlined_call_operand.vmem [shape: f32[1,32], index: 2, kind: input, shape index: {}]   ;;  %s267_s3 = inlined_call_operand.vmem [shape: f32[1,32], index: 3, kind: input, shape index: {}]   ;;  %s268_s4 = inlined_call_operand.vmem [shape: f32[1,32], index: 4, kind: input, shape index: {}]   ;;  %s269_s5 = inlined_call_operand.vmem [shape: f32[16,32], index: 5, kind: output, shape index: {}]  }
   0x1   :  { %170 = vmatprep.subr.bf16.mxu0 %v188_v0  ;;  %v33_v1 = vld [vmem:[%s264_s1] sm:$0xff]  ;;  %v34_v2 = vld [vmem:[%s264_s1 + $0x8] sm:$0xff]  ;;  %v35_v3 = vld [vmem:[%s264_s1 + $0x10] sm:$0xff]  ;;  %174 = vmatprep.mubr.msk.bf16.mxu0 %vm189_vm1, %v188_v0  ;;  %26 = vst.msk [vmem:[#allocation2] sm:$0xff] %vm25_vm0, %v188_v0 }
   0x2   :  { %27 = vst.msk [vmem:[#allocation2 + $0x8] sm:$0xff] %vm25_vm0, %v188_v0  ;;  %v37_v4 = vpack.c.bf16 %v34_v2, %v33_v1  ;;  %v36_v5 = vld [vmem:[%s264_s1 + $0x18] sm:$0xff]  ;;  %v30_v7 = vld [vmem:[%s265_s0] sm:$0xff]  ;;  %v31_v8 = vld [vmem:[%s265_s0 + $0x8] sm:$0xff] }
   0x3   :  { %v38_v6 = vpack.c.bf16 %v36_v5, %v35_v3  ;;  %v32_v9 = vpack.c.bf16 %v31_v8, %v30_v7  ;;  %v164_v18 = vld [vmem:[%s266_s2] ss:$0 sm:$0xff] }
   0x4   :  { %171 = vmatpush3.bf16.msra.mxu0 %v37_v4  ;;  %v165_v52 = vld [vmem:[%s267_s3] ss:$0 sm:$0xff] }
   0x5   :  { %172 = vmatprep.subr.bf16.mxu0 %v188_v0  ;;  %v166_v54 = vld [vmem:[%s268_s4] ss:$0 sm:$0xff] }
   0x8   :  { %173 = vmatpush3.bf16.msra.mxu0 %v38_v6  ;;  %v28_v10 = vld [vmem:[#allocation2] sm:$0xff] }
   0x9   :  { %v29_v12 = vld [vmem:[#allocation2 + $0x8] sm:$0xff] }
   0xb   :  { %175 = vmatmul.mubr.msk.bf16.vlgmr.msra.gmra.mrb[0].mxu0 %vm25_vm0, %v32_v9 }
  0xde   :  { %v77_v11 = vpop.f32.mrb[0].mxu0 }
  0xdf   :  { %v84_v13 = vadd.f32 %v77_v11, %v28_v10  ;;  %v176_v14 = vpop.f32.mrb[1].mxu0 }
  0xe0   :  { %v80_v15 = vpop.f32.mrb[2].mxu0 }
  0xe1   :  { %86 = vst.msk [vmem:[#allocation2] sm:$0xff] %vm25_vm0, %v84_v13  ;;  %v85_v16 = vadd.f32 %v80_v15, %v29_v12  ;;  %v177_v17 = vpop.f32.mrb[3].mxu0 }
  0xe3   :  { %87 = vst.msk [vmem:[#allocation2 + $0x8] sm:$0xff] %vm25_vm0, %v85_v16 }
  0xe8   :  { %v91_v19 = vld [vmem:[#allocation2] sm:$0xff] }
  0xe9   :  { %v100_v20 = vadd.f32 %v164_v18, %v91_v19 }
  0xea   :  { %v92_v21 = vld [vmem:[#allocation2 + $0x8] sm:$0xff] }
  0xeb   :  { %v104_v22 = vmul.f32 0.70710677, %v100_v20  ;;  %v101_v23 = vadd.f32 %v164_v18, %v92_v21  ;;  %v102_v26 = vmul.f32 0.5, %v100_v20 }
  0xed   :  { %180 = verf.f32 %v104_v22  ;;  %v105_v24 = vmul.f32 0.70710677, %v101_v23  ;;  %v103_v30 = vmul.f32 0.5, %v101_v23 }
  0xef   :  { %182 = verf.f32 %v105_v24 }
  0xf7   :  { %v181_v25 = vpop.eup %180 }
  0xf8   :  { %v108_v27 = vadd.f32 1.0, %v181_v25 }
  0xf9   :  { %v183_v28 = vpop.eup %182 }
  0xfa   :  { %v110_v29 = vmul.f32 %v108_v27, %v102_v26  ;;  %v109_v31 = vadd.f32 1.0, %v183_v28 }
  0xfc   :  { %v112_v32 = vsel %vm25_vm0, %v110_v29, 0.0  ;;  %v111_v33 = vmul.f32 %v109_v31, %v103_v30 }
  0xfd   :  { %113 = vadd.xlane.f32.xlu0 %v112_v32 }
  0xfe   :  { %v115_v34 = vsel %vm25_vm0, %v111_v33, 0.0 }
 0x101   :  { %116 = vadd.xlane.f32.xlu0 %v115_v34 }
 0x18a   :  { %v114_v35 = vpop.xlane.xlu0 %113 }
 0x18b   :  { %v119_v36 = vmul.f32 0.03125, %v114_v35 }
 0x18d   :  { %v121_v37 = vsub.f32 %v110_v29, %v119_v36 }
 0x18e   :  { %v117_v38 = vpop.xlane.xlu0 %116 }
 0x18f   :  { %v120_v39 = vmul.f32 0.03125, %v117_v38  ;;  %v123_v40 = vmul.f32 %v121_v37, %v121_v37 }
 0x191   :  { %v122_v41 = vsub.f32 %v111_v33, %v120_v39  ;;  %v125_v42 = vsel %vm25_vm0, %v123_v40, 0.0 }
 0x192   :  { %126 = vadd.xlane.f32.xlu1 %v125_v42 }
 0x193   :  { %v124_v43 = vmul.f32 %v122_v41, %v122_v41 }
 0x195   :  { %v128_v44 = vsel %vm25_vm0, %v124_v43, 0.0 }
 0x196   :  { %129 = vadd.xlane.f32.xlu1 %v128_v44 }
 0x21f   :  { %v127_v45 = vpop.xlane.xlu1 %126 }
 0x220   :  { %v131_v46 = vmul.f32 0.03125, %v127_v45 }
 0x222   :  { %v133_v47 = vadd.f32 1e-05, %v131_v46 }
 0x223   :  { %v130_v48 = vpop.xlane.xlu1 %129 }
 0x224   :  { %184 = vrsqrt.f32 %v133_v47  ;;  %v132_v49 = vmul.f32 0.03125, %v130_v48 }
 0x226   :  { %v134_v50 = vadd.f32 1e-05, %v132_v49 }
 0x228   :  { %186 = vrsqrt.f32 %v134_v50 }
 0x22e   :  { %v185_v51 = vpop.eup %184 }
 0x22f   :  { %v137_v53 = vmul.f32 %v185_v51, %v121_v37 }
 0x231   :  { %v146_v55 = vmul.f32 %v165_v52, %v137_v53 }
 0x232   :  { %v187_v56 = vpop.eup %186 }
 0x233   :  { %v155_v57 = vadd.f32 %v166_v54, %v146_v55  ;;  %v138_v58 = vmul.f32 %v187_v56, %v122_v41 }
 0x235   :  { %157 = vst.msk [vmem:[%s269_s5] sm:$0xff] %vm25_vm0, %v155_v57  ;;  %v147_v59 = vmul.f32 %v165_v52, %v138_v58 }
 0x237   :  { %v156_v60 = vadd.f32 %v166_v54, %v147_v59 }
 0x239   :  { %158 = vst.msk [vmem:[%s269_s5 + $0x8] sm:$0xff] %vm25_vm0, %v156_v60 }

// kernel: model_forward.18
= control target key start
LH: loop header
LB: loop body
LE: loop exit
PB: predicated region body
PF: predicated region fallthrough
CT: control target
= control target key end

     0   :  { %v242_v3 = vmov 0.0   ;;  %vm243_vm0 = vmmov 0   ;;  %vm31_vm1 = vcmask 261120   ;;  %s362_s0 = inlined_call_operand.vmem [shape: f32[16,64], index: 0, kind: input, shape index: {}]   ;;  %s363_s1 = inlined_call_operand.vmem [shape: f32[64,32], index: 1, kind: input, shape index: {}]   ;;  %s364_s2 = inlined_call_operand.vmem [shape: f32[1,32], index: 2, kind: input, shape index: {}]   ;;  %s365_s3 = inlined_call_operand.vmem [shape: f32[16,32], index: 3, kind: input, shape index: {}]   ;;  %s366_s4 = inlined_call_operand.vmem [shape: f32[1,32], index: 4, kind: input, shape index: {}]   ;;  %s367_s5 = inlined_call_operand.vmem [shape: f32[1,32], index: 5, kind: input, shape index: {}]   ;;  %s368_s6 = inlined_call_operand.hbm [shape: f32[16,32], index: 6, kind: output, shape index: {0}]   ;;  %s369_s7 = inlined_call_operand.vmem [shape: f32[16,32], index: 7, kind: output, shape index: {1}]  }
   0x1   :  { %v39_v0 = vld [vmem:[%s363_s1] sm:$0xff]  ;;  %v40_v1 = vld [vmem:[%s363_s1 + $0x8] sm:$0xff]  ;;  %v41_v2 = vld [vmem:[%s363_s1 + $0x10] sm:$0xff]  ;;  %197 = vmatprep.subr.bf16.mxu0 %v242_v3  ;;  %205 = vmatprep.mubr.msk.bf16.mxu0 %vm243_vm0, %v242_v3  ;;  %32 = vst.msk [vmem:[#allocation2] sm:$0xff] %vm31_vm1, %v242_v3 }
   0x2   :  { %v47_v4 = vpack.c.bf16 %v40_v1, %v39_v0  ;;  %v42_v5 = vld [vmem:[%s363_s1 + $0x18] sm:$0xff]  ;;  %33 = vst.msk [vmem:[#allocation2 + $0x8] sm:$0xff] %vm31_vm1, %v242_v3 }
   0x3   :  { %v48_v6 = vpack.c.bf16 %v42_v5, %v41_v2 }
   0x4   :  { %198 = vmatpush3.bf16.msra.mxu0 %v47_v4 }
   0x5   :  { %13 = vsyncpa [#allocation4], 0  ;;  %199 = vmatprep.subr.bf16.mxu0 %v242_v3  ;;  %v43_v7 = vld [vmem:[%s363_s1 + $0x20] sm:$0xff]  ;;  %v44_v8 = vld [vmem:[%s363_s1 + $0x28] sm:$0xff]  ;;  %vm51_vm2 = vcmask 523264  }
   0x6   :  { %v49_v9 = vpack.c.bf16 %v44_v8, %v43_v7  ;;  %v45_v10 = vld [vmem:[%s363_s1 + $0x30] sm:$0xff]  ;;  %v46_v11 = vld [vmem:[%s363_s1 + $0x38] sm:$0xff]  ;;  %v36_v13 = vld [vmem:[%s362_s0] sm:$0xff] }
   0x7   :  { %v50_v12 = vpack.c.bf16 %v46_v11, %v45_v10  ;;  %v37_v14 = vld [vmem:[%s362_s0 + $0x8] sm:$0xff]  ;;  %v189_v24 = vld [vmem:[%s364_s2] ss:$0 sm:$0xff]  ;;  %s244_s2 = smov [#allocation3]  }
   0x8   :  { %200 = vmatpush3.bf16.msra.mxu0 %v48_v6  ;;  %v38_v15 = vpack.c.bf16 %v37_v14, %v36_v13  ;;  %v34_v16 = vld [vmem:[#allocation2] sm:$0xff]  ;;  %v118_v29 = vld [vmem:[%s365_s3 + $0x8] sm:$0xff] }
   0x9   :  { %201 = vmatprep.subr.bf16.mxu0 %v242_v3  ;;  %v35_v18 = vld [vmem:[#allocation2 + $0x8] sm:$0xff]  ;;  %v117_v26 = vld [vmem:[%s365_s3] sm:$0xff]  ;;  %s173_s3 = sshll.u32 %s244_s2, 4  ;;  %s174_s3 = int_to_ptr.vmem [resolvable:$true] %s173_s3 }
   0xa   :  { %s218_s25 = scalar_lea.vmem %s174_s3, 256  ;;  %p223_p1 = scmp.lt.s32.totalorder %s174_s3, %s174_s3 }
   0xb   :  { %p219_p0 = scmp.ne.s32.totalorder %s174_s3, %s218_s25  ;;  %p224_p2 = scmp.lt.s32.totalorder %s218_s25, %s218_s25 }
   0xc   :  { %202 = vmatpush3.bf16.msra.mxu0 %v49_v9 }
   0xd   :  { %203 = vmatprep.subr.bf16.mxu0 %v242_v3  ;;  %p225_p3 = por %p224_p2, %p223_p1 }
   0xf   :  { %p226_p4 = pnand %p225_p3, %p219_p0 }
  0x10   :  { %204 = vmatpush3.bf16.msra.mxu0 %v50_v12 }
  0x13   :  { %206 = vmatmul.mubr.msk.bf16.vlgmr.msra.gmra.mrb[0].mxu0 %vm51_vm2, %v38_v15 }
  0xe6   :  { %v89_v17 = vpop.f32.mrb[0].mxu0 }
  0xe7   :  { %v96_v19 = vadd.f32 %v89_v17, %v34_v16  ;;  %v207_v20 = vpop.f32.mrb[1].mxu0 }
  0xe8   :  { %v92_v21 = vpop.f32.mrb[2].mxu0 }
  0xe9   :  { %99 = vst.msk [vmem:[#allocation2] sm:$0xff] %vm31_vm1, %v96_v19  ;;  %v97_v22 = vadd.f32 %v92_v21, %v35_v18  ;;  %v208_v23 = vpop.f32.mrb[3].mxu0 }
  0xeb   :  { %100 = vst.msk [vmem:[#allocation2 + $0x8] sm:$0xff] %vm31_vm1, %v97_v22 }
  0xf0   :  { %v104_v25 = vld [vmem:[#allocation2] sm:$0xff] }
  0xf1   :  { %v113_v27 = vadd.f32 %v189_v24, %v104_v25 }
  0xf2   :  { %v105_v28 = vld [vmem:[#allocation2 + $0x8] sm:$0xff] }
  0xf3   :  { %v119_v30 = vadd.f32 %v117_v26, %v113_v27  ;;  %115 = vst.msk [vmem:[#allocation3] sm:$0xff] %vm31_vm1, %v113_v27  ;;  %v114_v31 = vadd.f32 %v189_v24, %v105_v28 }
  0xf5   :  { %v121_v32 = vsel %vm31_vm1, %v119_v30, 0.0  ;;  %116 = vst.msk [vmem:[#allocation3 + $0x8] sm:$0xff] %vm31_vm1, %v114_v31  ;;  %v120_v33 = vadd.f32 %v118_v29, %v114_v31 }
  0xf6   :  { %122 = vadd.xlane.f32.xlu0 %v121_v32 }
  0xf7   :  { %v124_v34 = vsel %vm31_vm1, %v120_v33, 0.0 }
  0xfa   :  { %125 = vadd.xlane.f32.xlu0 %v124_v34 }
 0x183   :  { %v123_v35 = vpop.xlane.xlu0 %122 }
 0x184   :  { %v128_v36 = vmul.f32 0.03125, %v123_v35 }
 0x186   :  { %v130_v37 = vsub.f32 %v119_v30, %v128_v36 }
 0x187   :  { %v126_v38 = vpop.xlane.xlu0 %125 }
 0x188   :  { %v129_v39 = vmul.f32 0.03125, %v126_v38  ;;  %v132_v40 = vmul.f32 %v130_v37, %v130_v37 }
 0x18a   :  { %v131_v41 = vsub.f32 %v120_v33, %v129_v39  ;;  %v134_v42 = vsel %vm31_vm1, %v132_v40, 0.0 }
 0x18b   :  { %135 = vadd.xlane.f32.xlu1 %v134_v42 }
 0x18c   :  { %v133_v43 = vmul.f32 %v131_v41, %v131_v41 }
 0x18e   :  { %v137_v44 = vsel %vm31_vm1, %v133_v43, 0.0 }
 0x18f   :  { %138 = vadd.xlane.f32.xlu1 %v137_v44 }
 0x190   :  { %229 = shalt.err (!%p226_p4)
}
 0x191   :  { %s230_s28 = scalar_lea.hbm %s368_s6, 256 }
 0x192   :  { %p231_p5 = scmp.ne.s32.totalorder %s368_s6, %s230_s28  ;;  %p234_p6 = scmp.lt.u32.totalorder %s230_s28, %s368_s6 }
 0x194   :  { %p236_p7 = pnand %p234_p6, %p231_p5 }
 0x196   :  { %239 = shalt.err (!%p236_p7)
}
 0x197   :  { %s245_s10 = smov 128   ;;  %s246_s11 = smov 8   ;;  %v190_v52 = vld [vmem:[%s366_s4] ss:$0 sm:$0xff] }
 0x198   :  { %179 = dma.vmem_to_hbm [thread:$0]  %s174_s3, 256, %s368_s6, [#allocation4], %s245_s10, %s245_s10, %s246_s11  }
 0x199   :  { %v191_v54 = vld [vmem:[%s367_s5] ss:$0 sm:$0xff] }
 0x218   :  { %v136_v45 = vpop.xlane.xlu1 %135 }
 0x219   :  { %v140_v46 = vmul.f32 0.03125, %v136_v45 }
 0x21b   :  { %v142_v47 = vadd.f32 1e-05, %v140_v46 }
 0x21c   :  { %v139_v48 = vpop.xlane.xlu1 %138 }
 0x21d   :  { %214 = vrsqrt.f32 %v142_v47  ;;  %v141_v49 = vmul.f32 0.03125, %v139_v48 }
 0x21f   :  { %v143_v50 = vadd.f32 1e-05, %v141_v49 }
 0x221   :  { %216 = vrsqrt.f32 %v143_v50 }
 0x227   :  { %v215_v51 = vpop.eup %214 }
 0x228   :  { %v146_v53 = vmul.f32 %v215_v51, %v130_v37 }
 0x22a   :  { %v155_v55 = vmul.f32 %v190_v52, %v146_v53 }
 0x22b   :  { %v217_v56 = vpop.eup %216 }
 0x22c   :  { %v164_v57 = vadd.f32 %v191_v54, %v155_v55  ;;  %v147_v58 = vmul.f32 %v217_v56, %v131_v41 }
 0x22e   :  { %166 = vst.msk [vmem:[%s369_s7] sm:$0xff] %vm31_vm1, %v164_v57  ;;  %v156_v59 = vmul.f32 %v190_v52, %v147_v58 }
 0x230   :  { %v165_v60 = vadd.f32 %v191_v54, %v156_v59 }
 0x232   :  { %167 = vst.msk [vmem:[%s369_s7 + $0x8] sm:$0xff] %vm31_vm1, %v165_v60 }
 0x233   :  { %240 = dma.done.wait [#allocation4], 256  }
 0x234   :  { %241 = vsyncadd [#allocation4], 4294967040 }
 0x235   :  { %187 = vsyncpa [#allocation4], 1 }

</bundles_post_ra>
